<compile_context>
chip_gen: v5e
topology: v5e:2x2
jax: 0.10.0
libtpu: 0.0.40
codegen_flags: <defaults>
</compile_context>

<pallas_src>
import functools

import jax
import jax.numpy as jnp
from jax.experimental import pallas as pl
from jax.experimental.pallas import tpu as pltpu

BN_EPS = 1e-5

_PARALLEL = pltpu.CompilerParams(dimension_semantics=("parallel",))


def _round_up(x, m):
    return ((x + m - 1) // m) * m


def _choose_tiling(m, tm_max, row_align):
    """Pick (tm, mp): row-tile size and padded row count.

    Prefers a tile that divides the (minimally padded) row count exactly, so
    the final un-pad slice is a no-op, and >= 2 grid steps so v7x can shard
    the parallel axis across both TensorCores.
    """
    mp = _round_up(m, row_align)
    limit = min(tm_max, mp)
    best = row_align
    t = row_align
    while t <= limit:
        if mp % t == 0:
            best = t
        t += row_align
    if mp // best < 2:                      # try to expose >= 2 grid steps
        t = best - row_align
        while t >= row_align:
            if mp % t == 0:
                best = t
                break
            t -= row_align
    return best, mp


# ---------------------------------------------------------------------------
# In-kernel helpers
# ---------------------------------------------------------------------------
def _layer1_act(x_ref, w_ref, b_ref):
    """y1 = relu(x @ W1f + b1f).  K (= keypoint feature dim) is tiny, so the
    matmul is done as K VPU broadcast-FMAs instead of an MXU push/pop."""
    x = x_ref[...].astype(jnp.float32)
    w = w_ref[...].astype(jnp.float32)
    b = b_ref[...]
    c = x.shape[1]
    if c <= 4:
        acc = x[:, 0:1] * w[0:1, :] + b
        for k in range(1, c):
            acc = acc + x[:, k:k + 1] * w[k:k + 1, :]
    else:
        acc = jnp.dot(x, w, preferred_element_type=jnp.float32) + b
    return jnp.maximum(acc, 0.0)


def _write_stats(st_ref, y, *, tm, m_total, mask_rows):
    """Per-tile column sum / sum-of-squares -> (1, 2, F) stats block."""
    if mask_rows:
        # Last tile may contain padded rows; they must not pollute the stats.
        row = pl.program_id(0) * tm + jax.lax.broadcasted_iota(
            jnp.int32, (tm, 1), 0)
        y = jnp.where(row < m_total, y, 0.0)
    col_sum = jnp.sum(y, axis=0, keepdims=True)
    col_sq = jnp.sum(y * y, axis=0, keepdims=True)
    st_ref[...] = jnp.concatenate([col_sum, col_sq], axis=0)[None]


# ---------------------------------------------------------------------------
# Kernels (one pallas_call each)
# ---------------------------------------------------------------------------
def _stats1_kernel(x_ref, w1_ref, b1_ref, st_ref, *, tm, m_total, mask_rows):
    """BN1 statistics of y1; y1 is never written to HBM."""
    y1 = _layer1_act(x_ref, w1_ref, b1_ref)
    _write_stats(st_ref, y1, tm=tm, m_total=m_total, mask_rows=mask_rows)


def _layer2_kernel(x_ref, w1_ref, b1_ref, w2_ref, b2_ref, y2_ref, st_ref, *,
                   tm, m_total, mask_rows):
    """Recompute y1 from x, then y2 = relu(y1 @ W2f + b2f) (BN1 folded into
    W2f/b2f).  Emits y2 and BN2 partial statistics."""
    y1 = _layer1_act(x_ref, w1_ref, b1_ref)
    y2 = jnp.dot(y1.astype(w2_ref.dtype), w2_ref[...],
                 preferred_element_type=jnp.float32) + b2_ref[...]
    y2 = jnp.maximum(y2, 0.0)
    y2_ref[...] = y2.astype(y2_ref.dtype)
    _write_stats(st_ref, y2, tm=tm, m_total=m_total, mask_rows=mask_rows)


def _stats3_kernel(y2_ref, w3_ref, b3_ref, st_ref, *, tm, m_total, mask_rows):
    """BN3 statistics of y3 = relu(y2 @ W3f + b3f); y3 is never written."""
    y3 = jnp.dot(y2_ref[...], w3_ref[...],
                 preferred_element_type=jnp.float32) + b3_ref[...]
    y3 = jnp.maximum(y3, 0.0)
    _write_stats(st_ref, y3, tm=tm, m_total=m_total, mask_rows=mask_rows)


def _final_kernel(y2_ref, w3_ref, b3_ref, sc_ref, sh_ref, o_ref):
    """Recompute y3 from y2, apply BN3 as one fused FMA, write final output."""
    y3 = jnp.dot(y2_ref[...], w3_ref[...],
                 preferred_element_type=jnp.float32) + b3_ref[...]
    y3 = jnp.maximum(y3, 0.0)
    o_ref[...] = (y3 * sc_ref[...] + sh_ref[...]).astype(o_ref.dtype)


# ---------------------------------------------------------------------------
# BlockSpec helpers & wrapper-side BN reduction
# ---------------------------------------------------------------------------
def _row_spec(tm, f):
    return pl.BlockSpec((tm, f), lambda i: (i, 0))


def _const_spec(shape):
    return pl.BlockSpec(shape, lambda i: (0,) * len(shape))


def _stats_spec(f):
    return pl.BlockSpec((1, 2, f), lambda i: (i, 0, 0))


def _bn_scale_shift(stats, m_total, gamma, beta):
    """Finish the cross-tile BN reduction; fold gamma/beta into (scale, shift)."""
    col_sum = jnp.sum(stats[:, 0, :], axis=0)
    col_sq = jnp.sum(stats[:, 1, :], axis=0)
    mean = col_sum / m_total
    var = jnp.maximum(col_sq / m_total - mean * mean, 0.0)   # biased variance
    scale = gamma.reshape(-1) * jax.lax.rsqrt(var + BN_EPS)
    shift = beta.reshape(-1) - mean * scale
    return scale, shift


# ---------------------------------------------------------------------------
# Public entry point
# ---------------------------------------------------------------------------
@functools.partial(jax.jit,
                   static_argnames=("tm_max", "compute_dtype", "out_dtype"))
def pose_encoder(x, adj, params, *, tm_max=1024,
                 compute_dtype=jnp.bfloat16, out_dtype=jnp.float32):
    B, T, N, C = x.shape
    M = B * T * N

    cdt = jnp.dtype(compute_dtype)
    odt = jnp.dtype(out_dtype)
    row_align = 16 if (cdt.itemsize == 2 or odt.itemsize == 2) else 8
    tm, mp = _choose_tiling(M, tm_max, row_align)
    grid_m = mp // tm
    mask_rows = mp != M

    x2d = x.reshape(M, C).astype(jnp.float32)
    if mask_rows:
        x2d = jnp.pad(x2d, ((0, mp - M), (0, 0)))

    # einsum('ij,bnc->bnc', adj, x) == sum(adj) * x (faithful to the reference;
    # the adjacency is never applied per-node).  Fold the scalar into weights.
    s = jnp.sum(adj.astype(jnp.float32))
    # Initial Linear (C->64) composes exactly with gc1's Linear.
    sw1 = s * params["w1"]
    w1f = (params["w0"] @ sw1).astype(jnp.float32)          # (C, 64), VPU path
    b1f = (params["b0"] @ sw1 + params["b1"]).astype(jnp.float32)

    # --- pass 1: BN1 statistics of y1 (y1 never materialized) -------------
    f1 = w1f.shape[1]
    st1 = pl.pallas_call(
        functools.partial(_stats1_kernel, tm=tm, m_total=M, mask_rows=mask_rows),
        grid=(grid_m,),
        in_specs=[_row_spec(tm, C), _const_spec(w1f.shape), _const_spec(b1f.shape)],
        out_specs=_stats_spec(f1),
        out_shape=jax.ShapeDtypeStruct((grid_m, 2, f1), jnp.float32),
        compiler_params=_PARALLEL,
    )(x2d, w1f, b1f)
    sc1, sh1 = _bn_scale_shift(st1, M, params["g1"], params["be1"])

    # Fold BN1 + adjacency scalar into layer-2 weights/bias.
    sw2 = s * params["w2"]
    w2f = (sc1[:, None] * sw2).astype(compute_dtype)
    b2f = (sh1[None, :] @ sw2 + params["b2"]).astype(jnp.float32)

    # --- pass 2: y2 + BN2 statistics (layer 1 recomputed from raw x) ------
    f2 = w2f.shape[1]
    y2, st2 = pl.pallas_call(
        functools.partial(_layer2_kernel, tm=tm, m_total=M, mask_rows=mask_rows),
        grid=(grid_m,),
        in_specs=[_row_spec(tm, C), _const_spec(w1f.shape), _const_spec(b1f.shape),
                  _const_spec(w2f.shape), _const_spec(b2f.shape)],
        out_specs=[_row_spec(tm, f2), _stats_spec(f2)],
        out_shape=[jax.ShapeDtypeStruct((mp, f2), compute_dtype),
                   jax.ShapeDtypeStruct((grid_m, 2, f2), jnp.float32)],
        compiler_params=_PARALLEL,
    )(x2d, w1f, b1f, w2f, b2f)
    sc2, sh2 = _bn_scale_shift(st2, M, params["g2"], params["be2"])

    # Fold BN2 + adjacency scalar into layer-3 weights/bias.
    sw3 = s * params["w3"]
    w3f = (sc2[:, None] * sw3).astype(compute_dtype)
    b3f = (sh2[None, :] @ sw3 + params["b3"]).astype(jnp.float32)

    # --- pass 3: BN3 statistics of y3 (y3 never materialized) -------------
    f3 = w3f.shape[1]
    st3 = pl.pallas_call(
        functools.partial(_stats3_kernel, tm=tm, m_total=M, mask_rows=mask_rows),
        grid=(grid_m,),
        in_specs=[_row_spec(tm, f2), _const_spec(w3f.shape), _const_spec(b3f.shape)],
        out_specs=_stats_spec(f3),
        out_shape=jax.ShapeDtypeStruct((grid_m, 2, f3), jnp.float32),
        compiler_params=_PARALLEL,
    )(y2, w3f, b3f)
    sc3, sh3 = _bn_scale_shift(st3, M, params["g3"], params["be3"])

    # --- pass 4: recompute y3 from y2, apply BN3, write the output --------
    out = pl.pallas_call(
        _final_kernel,
        grid=(grid_m,),
        in_specs=[_row_spec(tm, f2), _const_spec(w3f.shape), _const_spec(b3f.shape),
                  _const_spec((1, f3)), _const_spec((1, f3))],
        out_specs=_row_spec(tm, f3),
        out_shape=jax.ShapeDtypeStruct((mp, f3), out_dtype),
        compiler_params=_PARALLEL,
    )(y2, w3f, b3f, sc3.reshape(1, f3), sh3.reshape(1, f3))

    if mask_rows:
        out = out[:M]
    return out.reshape(B, T, N, f3)


# ---------------------------------------------------------------------------
# Parameters & pure-JAX reference (for correctness check)
# ---------------------------------------------------------------------------
def init_params(key, feature_dim):
    """Deterministic init mirroring the PyTorch module's parameter shapes.

    Linear weights are stored transposed (in_features, out_features) so the
    math is x @ W + b.  BN: gamma=1, beta=0 (PyTorch default init).
    """
    dims = [(feature_dim, 64), (64, 64), (64, 128), (128, 256)]
    keys = jax.random.split(key, 2 * len(dims))
    params = {}
    for i, (fin, fout) in enumerate(dims):
        bound = 1.0 / jnp.sqrt(jnp.float32(fin))
        params[f"w{i}"] = jax.random.uniform(
            keys[2 * i], (fin, fout), jnp.float32, -bound, bound)
        params[f"b{i}"] = jax.random.uniform(
            keys[2 * i + 1], (1, fout), jnp.float32, -bound, bound)
    for i, f in zip((1, 2, 3), (64, 128, 256)):
        params[f"g{i}"] = jnp.ones((1, f), jnp.float32)
        params[f"be{i}"] = jnp.zeros((1, f), jnp.float32)
    return params


def pose_encoder_reference(x, adj, params):
    B, T, N, C = x.shape
    s = jnp.sum(adj.astype(jnp.float32))
    h = x.reshape(-1, C).astype(jnp.float32) @ params["w0"] + params["b0"]
    for i in (1, 2, 3):
        h = jnp.maximum((s * h) @ params[f"w{i}"] + params[f"b{i}"], 0.0)
        mean = jnp.mean(h, axis=0, keepdims=True)
        var = jnp.mean((h - mean) ** 2, axis=0, keepdims=True)
        h = (h - mean) * jax.lax.rsqrt(var + BN_EPS) * params[f"g{i}"] \
            + params[f"be{i}"]
    return h.reshape(B, T, N, 256)


if __name__ == "__main__":
    key = jax.random.PRNGKey(0)
    k_param, k_x, k_adj = jax.random.split(key, 3)

    # Small shapes: batch=2, T=8 frames, N=16 keypoints, C=2 (x, y coords).
    B, T, N, C = 2, 8, 16, 2
    params = init_params(k_param, feature_dim=C)

    x = jax.random.normal(k_x, (B, T, N, C), jnp.float32)

    # Deterministic adjacency: symmetric 0/1 connectivity + self-loops.
    a = (jax.random.uniform(k_adj, (N, N)) > 0.7).astype(jnp.float32)
    adj = jnp.clip(a + a.T + jnp.eye(N, dtype=jnp.float32), 0.0, 1.0)

    # f32 path: exact-semantics run, checked against the pure-JAX reference.
    out = pose_encoder(x, adj, params,
                       compute_dtype=jnp.float32, out_dtype=jnp.float32)
    jax.block_until_ready(out)
    assert out.shape == (B, T, N, 256), out.shape

    ref = pose_encoder_reference(x, adj, params)
    max_err = float(jnp.max(jnp.abs(out - ref)))
    assert max_err < 1e-2, f"max abs error vs reference: {max_err}"

    # Default bf16 compute path + bf16 output (v6e/v7x optimization) — smoke test.
    out_bf16 = pose_encoder(x, adj, params, out_dtype=jnp.bfloat16)
    jax.block_until_ready(out_bf16)
    assert out_bf16.shape == (B, T, N, 256)
    assert bool(jnp.all(jnp.isfinite(out_bf16.astype(jnp.float32))))

    print("KERNEL_OK")
</pallas_src>

<mosaic_0001>
module attributes {stable_mosaic.version = 11 : i64} {
  func.func @_stats1_kernel(%arg0: i32, %arg1: memref<128x2xf32, #tpu.memory_space<vmem>>, %arg2: memref<2x64xf32, #tpu.memory_space<vmem>>, %arg3: memref<1x64xf32, #tpu.memory_space<vmem>>, %arg4: memref<1x2x64xf32, #tpu.memory_space<vmem>>) attributes {dimension_semantics = [#tpu.dimension_semantics<parallel>], iteration_bounds = array<i64: 2>, scalar_prefetch = 0 : i64, scratch_operands = 0 : i64, tpu.core_type = #tpu.core_type<tc>, window_params = [{transform_indices = @transform_0, window_bounds = array<i64: 128, 2>}, {pipeline_mode = #tpu.pipeline_mode<synchronous>, transform_indices = @transform_1, window_bounds = array<i64: 2, 64>}, {pipeline_mode = #tpu.pipeline_mode<synchronous>, transform_indices = @transform_2, window_bounds = array<i64: 1, 64>}, {transform_indices = @transform_3, window_bounds = array<i64: 1, 2, 64>}]} {
    %c0 = arith.constant 0 : index
    %c0_0 = arith.constant 0 : index
    %0 = vector.load %arg1[%c0, %c0_0] : memref<128x2xf32, #tpu.memory_space<vmem>>, vector<128x2xf32>
    %c0_1 = arith.constant 0 : index
    %c0_2 = arith.constant 0 : index
    %1 = vector.load %arg2[%c0_1, %c0_2] : memref<2x64xf32, #tpu.memory_space<vmem>>, vector<2x64xf32>
    %c0_3 = arith.constant 0 : index
    %c0_4 = arith.constant 0 : index
    %2 = vector.load %arg3[%c0_3, %c0_4] : memref<1x64xf32, #tpu.memory_space<vmem>>, vector<1x64xf32>
    %3 = vector.extract_strided_slice %0 {offsets = [0, 0], sizes = [128, 1], strides = [1, 1]} : vector<128x2xf32> to vector<128x1xf32>
    %4 = vector.extract_strided_slice %1 {offsets = [0, 0], sizes = [1, 64], strides = [1, 1]} : vector<2x64xf32> to vector<1x64xf32>
    %5 = vector.broadcast %3 : vector<128x1xf32> to vector<128x64xf32>
    %6 = vector.broadcast %4 : vector<1x64xf32> to vector<128x64xf32>
    %7 = arith.mulf %5, %6 : vector<128x64xf32>
    %8 = vector.broadcast %2 : vector<1x64xf32> to vector<128x64xf32>
    %9 = arith.addf %7, %8 : vector<128x64xf32>
    %10 = vector.extract_strided_slice %0 {offsets = [0, 1], sizes = [128, 1], strides = [1, 1]} : vector<128x2xf32> to vector<128x1xf32>
    %11 = vector.extract_strided_slice %1 {offsets = [1, 0], sizes = [1, 64], strides = [1, 1]} : vector<2x64xf32> to vector<1x64xf32>
    %12 = vector.broadcast %10 : vector<128x1xf32> to vector<128x64xf32>
    %13 = vector.broadcast %11 : vector<1x64xf32> to vector<128x64xf32>
    %14 = arith.mulf %12, %13 : vector<128x64xf32>
    %15 = arith.addf %9, %14 : vector<128x64xf32>
    %cst = arith.constant 0.000000e+00 : f32
    %16 = vector.broadcast %cst : f32 to vector<128x64xf32>
    %17 = arith.maximumf %15, %16 : vector<128x64xf32>
    %cst_5 = arith.constant dense<0.000000e+00> : vector<64xf32>
    %18 = vector.multi_reduction <add>, %17, %cst_5 [0] : vector<128x64xf32> to vector<64xf32>
    %19 = vector.shape_cast %18 : vector<64xf32> to vector<1x64xf32>
    %20 = arith.mulf %17, %17 : vector<128x64xf32>
    %cst_6 = arith.constant dense<0.000000e+00> : vector<64xf32>
    %21 = vector.multi_reduction <add>, %20, %cst_6 [0] : vector<128x64xf32> to vector<64xf32>
    %22 = vector.shape_cast %21 : vector<64xf32> to vector<1x64xf32>
    %23 = tpu.concatenate %19, %22 in 0 : vector<1x64xf32>, vector<1x64xf32> -> vector<2x64xf32>
    %24 = vector.shape_cast %23 : vector<2x64xf32> to vector<1x2x64xf32>
    %c0_7 = arith.constant 0 : index
    %c0_8 = arith.constant 0 : index
    %c0_9 = arith.constant 0 : index
    %25 = vector.load %arg4[%c0_7, %c0_8, %c0_9] : memref<1x2x64xf32, #tpu.memory_space<vmem>>, vector<1x2x64xf32>
    tpu.vector_store %arg4[%c0_7, %c0_8, %c0_9], %24 {strides = array<i32>} : memref<1x2x64xf32, #tpu.memory_space<vmem>>, vector<1x2x64xf32>,
    return
  }
  func.func @transform_0(%arg0: i32) -> (i32, i32) {
    %c0_i32 = arith.constant 0 : i32
    %c0_i32_0 = arith.constant 0 : i32
    return %arg0, %c0_i32 : i32, i32
  }
  func.func @transform_1(%arg0: i32) -> (i32, i32) {
    %c0_i32 = arith.constant 0 : i32
    %c0_i32_0 = arith.constant 0 : i32
    %c0_i32_1 = arith.constant 0 : i32
    return %c0_i32, %c0_i32_0 : i32, i32
  }
  func.func @transform_2(%arg0: i32) -> (i32, i32) {
    %c0_i32 = arith.constant 0 : i32
    %c0_i32_0 = arith.constant 0 : i32
    %c0_i32_1 = arith.constant 0 : i32
    return %c0_i32, %c0_i32_0 : i32, i32
  }
  func.func @transform_3(%arg0: i32) -> (i32, i32, i32) {
    %c0_i32 = arith.constant 0 : i32
    %c0_i32_0 = arith.constant 0 : i32
    %c0_i32_1 = arith.constant 0 : i32
    return %arg0, %c0_i32, %c0_i32_0 : i32, i32, i32
  }
}

module attributes {stable_mosaic.version = 11 : i64} {
  func.func @_layer2_kernel(%arg0: i32, %arg1: memref<128x2xf32, #tpu.memory_space<vmem>>, %arg2: memref<2x64xf32, #tpu.memory_space<vmem>>, %arg3: memref<1x64xf32, #tpu.memory_space<vmem>>, %arg4: memref<64x128xf32, #tpu.memory_space<vmem>>, %arg5: memref<1x128xf32, #tpu.memory_space<vmem>>, %arg6: memref<128x128xf32, #tpu.memory_space<vmem>>, %arg7: memref<1x2x128xf32, #tpu.memory_space<vmem>>) attributes {dimension_semantics = [#tpu.dimension_semantics<parallel>], iteration_bounds = array<i64: 2>, scalar_prefetch = 0 : i64, scratch_operands = 0 : i64, tpu.core_type = #tpu.core_type<tc>, window_params = [{transform_indices = @transform_0, window_bounds = array<i64: 128, 2>}, {pipeline_mode = #tpu.pipeline_mode<synchronous>, transform_indices = @transform_1, window_bounds = array<i64: 2, 64>}, {pipeline_mode = #tpu.pipeline_mode<synchronous>, transform_indices = @transform_2, window_bounds = array<i64: 1, 64>}, {pipeline_mode = #tpu.pipeline_mode<synchronous>, transform_indices = @transform_3, window_bounds = array<i64: 64, 128>}, {pipeline_mode = #tpu.pipeline_mode<synchronous>, transform_indices = @transform_4, window_bounds = array<i64: 1, 128>}, {transform_indices = @transform_5, window_bounds = array<i64: 128, 128>}, {transform_indices = @transform_6, window_bounds = array<i64: 1, 2, 128>}]} {
    %c0 = arith.constant 0 : index
    %c0_0 = arith.constant 0 : index
    %0 = vector.load %arg1[%c0, %c0_0] : memref<128x2xf32, #tpu.memory_space<vmem>>, vector<128x2xf32>
    %c0_1 = arith.constant 0 : index
    %c0_2 = arith.constant 0 : index
    %1 = vector.load %arg2[%c0_1, %c0_2] : memref<2x64xf32, #tpu.memory_space<vmem>>, vector<2x64xf32>
    %c0_3 = arith.constant 0 : index
    %c0_4 = arith.constant 0 : index
    %2 = vector.load %arg3[%c0_3, %c0_4] : memref<1x64xf32, #tpu.memory_space<vmem>>, vector<1x64xf32>
    %3 = vector.extract_strided_slice %0 {offsets = [0, 0], sizes = [128, 1], strides = [1, 1]} : vector<128x2xf32> to vector<128x1xf32>
    %4 = vector.extract_strided_slice %1 {offsets = [0, 0], sizes = [1, 64], strides = [1, 1]} : vector<2x64xf32> to vector<1x64xf32>
    %5 = vector.broadcast %3 : vector<128x1xf32> to vector<128x64xf32>
    %6 = vector.broadcast %4 : vector<1x64xf32> to vector<128x64xf32>
    %7 = arith.mulf %5, %6 : vector<128x64xf32>
    %8 = vector.broadcast %2 : vector<1x64xf32> to vector<128x64xf32>
    %9 = arith.addf %7, %8 : vector<128x64xf32>
    %10 = vector.extract_strided_slice %0 {offsets = [0, 1], sizes = [128, 1], strides = [1, 1]} : vector<128x2xf32> to vector<128x1xf32>
    %11 = vector.extract_strided_slice %1 {offsets = [1, 0], sizes = [1, 64], strides = [1, 1]} : vector<2x64xf32> to vector<1x64xf32>
    %12 = vector.broadcast %10 : vector<128x1xf32> to vector<128x64xf32>
    %13 = vector.broadcast %11 : vector<1x64xf32> to vector<128x64xf32>
    %14 = arith.mulf %12, %13 : vector<128x64xf32>
    %15 = arith.addf %9, %14 : vector<128x64xf32>
    %cst = arith.constant 0.000000e+00 : f32
    %16 = vector.broadcast %cst : f32 to vector<128x64xf32>
    %17 = arith.maximumf %15, %16 : vector<128x64xf32>
    %c0_5 = arith.constant 0 : index
    %c0_6 = arith.constant 0 : index
    %18 = vector.load %arg4[%c0_5, %c0_6] : memref<64x128xf32, #tpu.memory_space<vmem>>, vector<64x128xf32>
    %cst_7 = arith.constant dense<0.000000e+00> : vector<128x128xf32>
    %19 = tpu.matmul %17, %18, %cst_7 {dimension_numbers = #tpu.dot_dimension_numbers<[1], [0], [0], [1], [0, 0, 1, 1], [], []>} : vector<128x64xf32>, vector<64x128xf32>, vector<128x128xf32> -> vector<128x128xf32>
    %c0_8 = arith.constant 0 : index
    %c0_9 = arith.constant 0 : index
    %20 = vector.load %arg5[%c0_8, %c0_9] : memref<1x128xf32, #tpu.memory_space<vmem>>, vector<1x128xf32>
    %21 = vector.broadcast %20 : vector<1x128xf32> to vector<128x128xf32>
    %22 = arith.addf %19, %21 : vector<128x128xf32>
    %cst_10 = arith.constant 0.000000e+00 : f32
    %23 = vector.broadcast %cst_10 : f32 to vector<128x128xf32>
    %24 = arith.maximumf %22, %23 : vector<128x128xf32>
    %c0_11 = arith.constant 0 : index
    %c0_12 = arith.constant 0 : index
    %25 = vector.load %arg6[%c0_11, %c0_12] : memref<128x128xf32, #tpu.memory_space<vmem>>, vector<128x128xf32>
    tpu.vector_store %arg6[%c0_11, %c0_12], %24 {strides = array<i32>} : memref<128x128xf32, #tpu.memory_space<vmem>>, vector<128x128xf32>,
    %cst_13 = arith.constant dense<0.000000e+00> : vector<128xf32>
    %26 = vector.multi_reduction <add>, %24, %cst_13 [0] : vector<128x128xf32> to vector<128xf32>
    %27 = vector.shape_cast %26 : vector<128xf32> to vector<1x128xf32>
    %28 = arith.mulf %24, %24 : vector<128x128xf32>
    %cst_14 = arith.constant dense<0.000000e+00> : vector<128xf32>
    %29 = vector.multi_reduction <add>, %28, %cst_14 [0] : vector<128x128xf32> to vector<128xf32>
    %30 = vector.shape_cast %29 : vector<128xf32> to vector<1x128xf32>
    %31 = tpu.concatenate %27, %30 in 0 : vector<1x128xf32>, vector<1x128xf32> -> vector<2x128xf32>
    %32 = vector.shape_cast %31 : vector<2x128xf32> to vector<1x2x128xf32>
    %c0_15 = arith.constant 0 : index
    %c0_16 = arith.constant 0 : index
    %c0_17 = arith.constant 0 : index
    %33 = vector.load %arg7[%c0_15, %c0_16, %c0_17] : memref<1x2x128xf32, #tpu.memory_space<vmem>>, vector<1x2x128xf32>
    tpu.vector_store %arg7[%c0_15, %c0_16, %c0_17], %32 {strides = array<i32>} : memref<1x2x128xf32, #tpu.memory_space<vmem>>, vector<1x2x128xf32>,
    return
  }
  func.func @transform_0(%arg0: i32) -> (i32, i32) {
    %c0_i32 = arith.constant 0 : i32
    %c0_i32_0 = arith.constant 0 : i32
    return %arg0, %c0_i32 : i32, i32
  }
  func.func @transform_1(%arg0: i32) -> (i32, i32) {
    %c0_i32 = arith.constant 0 : i32
    %c0_i32_0 = arith.constant 0 : i32
    %c0_i32_1 = arith.constant 0 : i32
    return %c0_i32, %c0_i32_0 : i32, i32
  }
  func.func @transform_2(%arg0: i32) -> (i32, i32) {
    %c0_i32 = arith.constant 0 : i32
    %c0_i32_0 = arith.constant 0 : i32
    %c0_i32_1 = arith.constant 0 : i32
    return %c0_i32, %c0_i32_0 : i32, i32
  }
  func.func @transform_3(%arg0: i32) -> (i32, i32) {
    %c0_i32 = arith.constant 0 : i32
    %c0_i32_0 = arith.constant 0 : i32
    %c0_i32_1 = arith.constant 0 : i32
    return %c0_i32, %c0_i32_0 : i32, i32
  }
  func.func @transform_4(%arg0: i32) -> (i32, i32) {
    %c0_i32 = arith.constant 0 : i32
    %c0_i32_0 = arith.constant 0 : i32
    %c0_i32_1 = arith.constant 0 : i32
    return %c0_i32, %c0_i32_0 : i32, i32
  }
  func.func @transform_5(%arg0: i32) -> (i32, i32) {
    %c0_i32 = arith.constant 0 : i32
    %c0_i32_0 = arith.constant 0 : i32
    return %arg0, %c0_i32 : i32, i32
  }
  func.func @transform_6(%arg0: i32) -> (i32, i32, i32) {
    %c0_i32 = arith.constant 0 : i32
    %c0_i32_0 = arith.constant 0 : i32
    %c0_i32_1 = arith.constant 0 : i32
    return %arg0, %c0_i32, %c0_i32_0 : i32, i32, i32
  }
}

module attributes {stable_mosaic.version = 11 : i64} {
  func.func @_stats3_kernel(%arg0: i32, %arg1: memref<128x128xf32, #tpu.memory_space<vmem>>, %arg2: memref<128x256xf32, #tpu.memory_space<vmem>>, %arg3: memref<1x256xf32, #tpu.memory_space<vmem>>, %arg4: memref<1x2x256xf32, #tpu.memory_space<vmem>>) attributes {dimension_semantics = [#tpu.dimension_semantics<parallel>], iteration_bounds = array<i64: 2>, scalar_prefetch = 0 : i64, scratch_operands = 0 : i64, tpu.core_type = #tpu.core_type<tc>, window_params = [{transform_indices = @transform_0, window_bounds = array<i64: 128, 128>}, {pipeline_mode = #tpu.pipeline_mode<synchronous>, transform_indices = @transform_1, window_bounds = array<i64: 128, 256>}, {pipeline_mode = #tpu.pipeline_mode<synchronous>, transform_indices = @transform_2, window_bounds = array<i64: 1, 256>}, {transform_indices = @transform_3, window_bounds = array<i64: 1, 2, 256>}]} {
    %c0 = arith.constant 0 : index
    %c0_0 = arith.constant 0 : index
    %0 = vector.load %arg1[%c0, %c0_0] : memref<128x128xf32, #tpu.memory_space<vmem>>, vector<128x128xf32>
    %c0_1 = arith.constant 0 : index
    %c0_2 = arith.constant 0 : index
    %1 = vector.load %arg2[%c0_1, %c0_2] : memref<128x256xf32, #tpu.memory_space<vmem>>, vector<128x256xf32>
    %cst = arith.constant dense<0.000000e+00> : vector<128x256xf32>
    %2 = tpu.matmul %0, %1, %cst {dimension_numbers = #tpu.dot_dimension_numbers<[1], [0], [0], [1], [0, 0, 1, 1], [], []>} : vector<128x128xf32>, vector<128x256xf32>, vector<128x256xf32> -> vector<128x256xf32>
    %c0_3 = arith.constant 0 : index
    %c0_4 = arith.constant 0 : index
    %3 = vector.load %arg3[%c0_3, %c0_4] : memref<1x256xf32, #tpu.memory_space<vmem>>, vector<1x256xf32>
    %4 = vector.broadcast %3 : vector<1x256xf32> to vector<128x256xf32>
    %5 = arith.addf %2, %4 : vector<128x256xf32>
    %cst_5 = arith.constant 0.000000e+00 : f32
    %6 = vector.broadcast %cst_5 : f32 to vector<128x256xf32>
    %7 = arith.maximumf %5, %6 : vector<128x256xf32>
    %cst_6 = arith.constant dense<0.000000e+00> : vector<256xf32>
    %8 = vector.multi_reduction <add>, %7, %cst_6 [0] : vector<128x256xf32> to vector<256xf32>
    %9 = vector.shape_cast %8 : vector<256xf32> to vector<1x256xf32>
    %10 = arith.mulf %7, %7 : vector<128x256xf32>
    %cst_7 = arith.constant dense<0.000000e+00> : vector<256xf32>
    %11 = vector.multi_reduction <add>, %10, %cst_7 [0] : vector<128x256xf32> to vector<256xf32>
    %12 = vector.shape_cast %11 : vector<256xf32> to vector<1x256xf32>
    %13 = tpu.concatenate %9, %12 in 0 : vector<1x256xf32>, vector<1x256xf32> -> vector<2x256xf32>
    %14 = vector.shape_cast %13 : vector<2x256xf32> to vector<1x2x256xf32>
    %c0_8 = arith.constant 0 : index
    %c0_9 = arith.constant 0 : index
    %c0_10 = arith.constant 0 : index
    %15 = vector.load %arg4[%c0_8, %c0_9, %c0_10] : memref<1x2x256xf32, #tpu.memory_space<vmem>>, vector<1x2x256xf32>
    tpu.vector_store %arg4[%c0_8, %c0_9, %c0_10], %14 {strides = array<i32>} : memref<1x2x256xf32, #tpu.memory_space<vmem>>, vector<1x2x256xf32>,
    return
  }
  func.func @transform_0(%arg0: i32) -> (i32, i32) {
    %c0_i32 = arith.constant 0 : i32
    %c0_i32_0 = arith.constant 0 : i32
    return %arg0, %c0_i32 : i32, i32
  }
  func.func @transform_1(%arg0: i32) -> (i32, i32) {
    %c0_i32 = arith.constant 0 : i32
    %c0_i32_0 = arith.constant 0 : i32
    %c0_i32_1 = arith.constant 0 : i32
    return %c0_i32, %c0_i32_0 : i32, i32
  }
  func.func @transform_2(%arg0: i32) -> (i32, i32) {
    %c0_i32 = arith.constant 0 : i32
    %c0_i32_0 = arith.constant 0 : i32
    %c0_i32_1 = arith.constant 0 : i32
    return %c0_i32, %c0_i32_0 : i32, i32
  }
  func.func @transform_3(%arg0: i32) -> (i32, i32, i32) {
    %c0_i32 = arith.constant 0 : i32
    %c0_i32_0 = arith.constant 0 : i32
    %c0_i32_1 = arith.constant 0 : i32
    return %arg0, %c0_i32, %c0_i32_0 : i32, i32, i32
  }
}

module attributes {stable_mosaic.version = 11 : i64} {
  func.func @_final_kernel(%arg0: i32, %arg1: memref<128x128xf32, #tpu.memory_space<vmem>>, %arg2: memref<128x256xf32, #tpu.memory_space<vmem>>, %arg3: memref<1x256xf32, #tpu.memory_space<vmem>>, %arg4: memref<1x256xf32, #tpu.memory_space<vmem>>, %arg5: memref<1x256xf32, #tpu.memory_space<vmem>>, %arg6: memref<128x256xf32, #tpu.memory_space<vmem>>) attributes {dimension_semantics = [#tpu.dimension_semantics<parallel>], iteration_bounds = array<i64: 2>, scalar_prefetch = 0 : i64, scratch_operands = 0 : i64, tpu.core_type = #tpu.core_type<tc>, window_params = [{transform_indices = @transform_0, window_bounds = array<i64: 128, 128>}, {pipeline_mode = #tpu.pipeline_mode<synchronous>, transform_indices = @transform_1, window_bounds = array<i64: 128, 256>}, {pipeline_mode = #tpu.pipeline_mode<synchronous>, transform_indices = @transform_2, window_bounds = array<i64: 1, 256>}, {pipeline_mode = #tpu.pipeline_mode<synchronous>, transform_indices = @transform_3, window_bounds = array<i64: 1, 256>}, {pipeline_mode = #tpu.pipeline_mode<synchronous>, transform_indices = @transform_4, window_bounds = array<i64: 1, 256>}, {transform_indices = @transform_5, window_bounds = array<i64: 128, 256>}]} {
    %c0 = arith.constant 0 : index
    %c0_0 = arith.constant 0 : index
    %0 = vector.load %arg1[%c0, %c0_0] : memref<128x128xf32, #tpu.memory_space<vmem>>, vector<128x128xf32>
    %c0_1 = arith.constant 0 : index
    %c0_2 = arith.constant 0 : index
    %1 = vector.load %arg2[%c0_1, %c0_2] : memref<128x256xf32, #tpu.memory_space<vmem>>, vector<128x256xf32>
    %cst = arith.constant dense<0.000000e+00> : vector<128x256xf32>
    %2 = tpu.matmul %0, %1, %cst {dimension_numbers = #tpu.dot_dimension_numbers<[1], [0], [0], [1], [0, 0, 1, 1], [], []>} : vector<128x128xf32>, vector<128x256xf32>, vector<128x256xf32> -> vector<128x256xf32>
    %c0_3 = arith.constant 0 : index
    %c0_4 = arith.constant 0 : index
    %3 = vector.load %arg3[%c0_3, %c0_4] : memref<1x256xf32, #tpu.memory_space<vmem>>, vector<1x256xf32>
    %4 = vector.broadcast %3 : vector<1x256xf32> to vector<128x256xf32>
    %5 = arith.addf %2, %4 : vector<128x256xf32>
    %cst_5 = arith.constant 0.000000e+00 : f32
    %6 = vector.broadcast %cst_5 : f32 to vector<128x256xf32>
    %7 = arith.maximumf %5, %6 : vector<128x256xf32>
    %c0_6 = arith.constant 0 : index
    %c0_7 = arith.constant 0 : index
    %8 = vector.load %arg4[%c0_6, %c0_7] : memref<1x256xf32, #tpu.memory_space<vmem>>, vector<1x256xf32>
    %9 = vector.broadcast %8 : vector<1x256xf32> to vector<128x256xf32>
    %10 = arith.mulf %7, %9 : vector<128x256xf32>
    %c0_8 = arith.constant 0 : index
    %c0_9 = arith.constant 0 : index
    %11 = vector.load %arg5[%c0_8, %c0_9] : memref<1x256xf32, #tpu.memory_space<vmem>>, vector<1x256xf32>
    %12 = vector.broadcast %11 : vector<1x256xf32> to vector<128x256xf32>
    %13 = arith.addf %10, %12 : vector<128x256xf32>
    %c0_10 = arith.constant 0 : index
    %c0_11 = arith.constant 0 : index
    %14 = vector.load %arg6[%c0_10, %c0_11] : memref<128x256xf32, #tpu.memory_space<vmem>>, vector<128x256xf32>
    tpu.vector_store %arg6[%c0_10, %c0_11], %13 {strides = array<i32>} : memref<128x256xf32, #tpu.memory_space<vmem>>, vector<128x256xf32>,
    return
  }
  func.func @transform_0(%arg0: i32) -> (i32, i32) {
    %c0_i32 = arith.constant 0 : i32
    %c0_i32_0 = arith.constant 0 : i32
    return %arg0, %c0_i32 : i32, i32
  }
  func.func @transform_1(%arg0: i32) -> (i32, i32) {
    %c0_i32 = arith.constant 0 : i32
    %c0_i32_0 = arith.constant 0 : i32
    %c0_i32_1 = arith.constant 0 : i32
    return %c0_i32, %c0_i32_0 : i32, i32
  }
  func.func @transform_2(%arg0: i32) -> (i32, i32) {
    %c0_i32 = arith.constant 0 : i32
    %c0_i32_0 = arith.constant 0 : i32
    %c0_i32_1 = arith.constant 0 : i32
    return %c0_i32, %c0_i32_0 : i32, i32
  }
  func.func @transform_3(%arg0: i32) -> (i32, i32) {
    %c0_i32 = arith.constant 0 : i32
    %c0_i32_0 = arith.constant 0 : i32
    %c0_i32_1 = arith.constant 0 : i32
    return %c0_i32, %c0_i32_0 : i32, i32
  }
  func.func @transform_4(%arg0: i32) -> (i32, i32) {
    %c0_i32 = arith.constant 0 : i32
    %c0_i32_0 = arith.constant 0 : i32
    %c0_i32_1 = arith.constant 0 : i32
    return %c0_i32, %c0_i32_0 : i32, i32
  }
  func.func @transform_5(%arg0: i32) -> (i32, i32) {
    %c0_i32 = arith.constant 0 : i32
    %c0_i32_0 = arith.constant 0 : i32
    return %arg0, %c0_i32 : i32, i32
  }
}

</mosaic_0001>

<bundles_post_ra>
// kernel: pose_encoder.4
= control target key start
LH: loop header
LB: loop body
LE: loop exit
PB: predicated region body
PF: predicated region fallthrough
CT: control target
= control target key end

     0   :  { %s623_s12 = smov 0   ;;  %s773_s0 = inlined_call_operand.vmem [shape: f32[256,2], index: 0, kind: input, shape index: {}]   ;;  %s774_s1 = inlined_call_operand.vmem [shape: f32[2,64], index: 1, kind: input, shape index: {}]   ;;  %s775_s2 = inlined_call_operand.vmem [shape: f32[1,64], index: 2, kind: input, shape index: {}]   ;;  %s776_s3 = inlined_call_operand.vmem [shape: f32[2,2,64], index: 3, kind: output, shape index: {}]  }
   0x1 LB: > { %s629_s13 = sadd.s32 4294967295, %s599_s12   ;;  %p570_p0 = scmp.ge.s32.totalorder %s599_s12, 1  ;;  %s599_s12 = sphi %s623_s12, %s13_s12  }
   0x2   : > { %p138_p1 = scmp.lt.s32.totalorder %s599_s12, 3 }
   0x4   : > { %p139_p2 = pnand %p570_p0, %p138_p1 }
   0x5   : > { %s571_s14 = sshll.u32 (!%p139_p2), %s629_s13, 4  ;;  %p167_p4 = scmp.lt.s32.totalorder (!%p139_p2), %s629_s13, 1 }
   0x6   : > { %142 = sbr.rel (%p139_p2) target bundleno = 239 (0xef), region = 32  ;;  %p162_p3 = scmp.lt.s32.totalorder (!%p139_p2), %s571_s14, 31 }
   0xb   : > { %v601_v0 = vmov 0   ;;  %s778_s14 = smov (!%p162_p3, %s571_s14), 31  ;;  %v602_v17 = vmov 1   ;;  %v187_v33 = vld [vmem:[%s774_s1] sm:$0x3]  ;;  %vm418_vm0 = vcmask 523264  }
   0xc   : > { %588 = vset.pattern.permute.xlu2 %v601_v0  ;;  %587 = vset.pattern.permute.xlu1 %v601_v0  ;;  %s572_s15 = sshll.u32 %s778_s14, 3  ;;  %v668_v36 = vperm.slane %v187_v33, 0  ;;  %v670_v37 = vperm.slane %v187_v33, 1  ;;  %v677_v40 = vld [vmem:[%s775_s2] ss:$0 sm:$0xff]  ;;  %s780_s13 = smov (!%p167_p4, %s629_s13), 1 }
   0xd   : > { %586 = vset.pattern.permute.xlu0 %v601_v0  ;;  %s637_s18 = scalar_lea.vmem %s773_s0, %s572_s15  ;;  %s573_s23 = sshll.u32 %s780_s13, 1  ;;  %vm509_vm1 = vcmask 1040384   ;;  %vm511_vm2 = vcmask 517120  }
   0xe   : > { %v175_v1 = vld [vmem:[%s637_s18 + $0x20] sm:$0xff]  ;;  %v173_v2 = vld [vmem:[%s637_s18 + $0x10] sm:$0xff]  ;;  %v176_v4 = vld [vmem:[%s637_s18 + $0x28] sm:$0xff]  ;;  %s170_s26 = scalar_lea.vmem %s776_s3, %s573_s23 }
   0xf   : > { %v171_v3 = vld [vmem:[%s637_s18] sm:$0xff]  ;;  %211 = vperm.xlu2 %588, %v175_v1   ;;  %201 = vperm.xlu1 %587, %v173_v2   ;;  %v174_v5 = vld [vmem:[%s637_s18 + $0x18] sm:$0xff]  ;;  %v172_v6 = vld [vmem:[%s637_s18 + $0x8] sm:$0xff] }
  0x10   : > { %191 = vperm.xlu0 %586, %v171_v3   ;;  %v179_v7 = vld [vmem:[%s637_s18 + $0x40] sm:$0xff]  ;;  %v178_v8 = vld [vmem:[%s637_s18 + $0x38] sm:$0xff]  ;;  %v177_v9 = vld [vmem:[%s637_s18 + $0x30] sm:$0xff] }
  0x11   : > { %v182_v10 = vld [vmem:[%s637_s18 + $0x58] sm:$0xff]  ;;  %v181_v11 = vld [vmem:[%s637_s18 + $0x50] sm:$0xff]  ;;  %v180_v12 = vld [vmem:[%s637_s18 + $0x48] sm:$0xff] }
  0x12   : > { %v185_v13 = vld [vmem:[%s637_s18 + $0x70] sm:$0xff]  ;;  %v184_v14 = vld [vmem:[%s637_s18 + $0x68] sm:$0xff]  ;;  %v183_v15 = vld [vmem:[%s637_s18 + $0x60] sm:$0xff] }
  0x13   : > { %v186_v16 = vld [vmem:[%s637_s18 + $0x78] sm:$0xff] }
  0x17   : > { %216 = vperm.xlu2 %588, %v176_v4   ;;  %206 = vperm.xlu1 %587, %v174_v5  }
  0x18   : > { %196 = vperm.xlu0 %586, %v172_v6  }
  0x1f   : > { %231 = vperm.xlu2 %588, %v179_v7   ;;  %226 = vperm.xlu1 %587, %v178_v8  }
  0x20   : > { %221 = vperm.xlu0 %586, %v177_v9  }
  0x27   : > { %246 = vperm.xlu2 %588, %v182_v10   ;;  %241 = vperm.xlu1 %587, %v181_v11  }
  0x28   : > { %236 = vperm.xlu0 %586, %v180_v12  }
  0x2f   : > { %261 = vperm.xlu2 %588, %v185_v13   ;;  %256 = vperm.xlu1 %587, %v184_v14  }
  0x30   : > { %251 = vperm.xlu0 %586, %v183_v15  }
  0x37   : > { %590 = vset.pattern.permute.xlu2 %v602_v17  ;;  %589 = vset.pattern.permute.xlu1 %v602_v17 }
  0x38   : > { %266 = vperm.xlu0 %586, %v186_v16   ;;  %310 = vperm.xlu2 %590, %v172_v6  }
  0x39   : > { %306 = vperm.xlu1 %589, %v171_v3  }
  0x40   : > { %591 = vset.pattern.permute.xlu0 %v602_v17  ;;  %322 = vperm.xlu2 %590, %v175_v1  }
  0x41   : > { %318 = vperm.xlu1 %589, %v174_v5   ;;  %314 = vperm.xlu0 %591, %v173_v2  }
  0x48   : > { %330 = vperm.xlu2 %590, %v177_v9  }
  0x49   : > { %326 = vperm.xlu1 %589, %v176_v4   ;;  %334 = vperm.xlu0 %591, %v178_v8  }
  0x50   : > { %342 = vperm.xlu2 %590, %v180_v12  }
  0x51   : > { %338 = vperm.xlu1 %589, %v179_v7   ;;  %346 = vperm.xlu0 %591, %v181_v11  }
  0x58   : > { %354 = vperm.xlu2 %590, %v183_v15  }
  0x59   : > { %350 = vperm.xlu1 %589, %v182_v10   ;;  %358 = vperm.xlu0 %591, %v184_v14  }
  0x60   : > { %366 = vperm.xlu2 %590, %v186_v16  }
  0x61   : > { %362 = vperm.xlu1 %589, %v185_v13  }
  0x69   : > { %v212_v18 = vpop.permute.xlu2 %211 }
  0x6a   : > { %v274_v50 = vmul.f32 %v668_v36, %v212_v18 }
  0x6c   : > { %v293_v56 = vadd.f32 %v677_v40, %v274_v50 }
  0x71   : > { %v217_v19 = vpop.permute.xlu2 %216 }
  0x72   : > { %v275_v57 = vmul.f32 %v668_v36, %v217_v19 }
  0x74   : > { %v294_v9 = vadd.f32 %v677_v40, %v275_v57 }
  0x79   : > { %v232_v20 = vpop.permute.xlu2 %231 }
  0x7a   : > { %v278_v16 = vmul.f32 %v668_v36, %v232_v20 }
  0x81   : > { %v202_v21 = vpop.permute.xlu1 %201  ;;  %v655_v23 = vpop.permute.xlu2 %246 }
  0x82   : > { %v192_v22 = vpop.permute.xlu0 %191  ;;  %v272_v51 = vmul.f32 %v668_v36, %v202_v21 }
  0x83   : > { %v270_v39 = vmul.f32 %v668_v36, %v192_v22 }
  0x84   : > { %v291_v58 = vadd.f32 %v677_v40, %v272_v51 }
  0x85   : > { %v289_v45 = vadd.f32 %v677_v40, %v270_v39 }
  0x89   : > { %v207_v24 = vpop.permute.xlu1 %206  ;;  %v657_v26 = vpop.permute.xlu2 %261 }
  0x8a   : > { %v197_v25 = vpop.permute.xlu0 %196  ;;  %v273_v52 = vmul.f32 %v668_v36, %v207_v24 }
  0x8b   : > { %v271_v38 = vmul.f32 %v668_v36, %v197_v25 }
  0x8c   : > { %v292_v62 = vadd.f32 %v677_v40, %v273_v52 }
  0x8d   : > { %v290_v43 = vadd.f32 %v677_v40, %v271_v38 }
  0x91   : > { %v227_v27 = vpop.permute.xlu1 %226 }
  0x92   : > { %v222_v28 = vpop.permute.xlu0 %221  ;;  %v311_v29 = vpop.permute.xlu2 %310  ;;  %v277_v10 = vmul.f32 %v668_v36, %v227_v27 }
  0x93   : > { %v371_v41 = vmul.f32 %v670_v37, %v311_v29  ;;  %v276_v59 = vmul.f32 %v668_v36, %v222_v28 }
  0x94   : > { %v296_v27 = vadd.f32 %v677_v40, %v277_v10 }
  0x95   : > { %v387_v48 = vadd.f32 %v371_v41, %v290_v43  ;;  %v295_v11 = vadd.f32 %v677_v40, %v276_v59 }
  0x97   : > { %v403_v54 = vmax.f32 %v387_v48, 0.0 }
  0x99   : > { %v659_v30 = vpop.permute.xlu1 %241  ;;  %v457_v2 = vmul.f32 %v403_v54, %v403_v54  ;;  %v420_v12 = vsel %vm418_vm0, %v403_v54, 0.0  ;;  %v297_v54 = vadd.f32 %v677_v40, %v278_v16 }
  0x9a   : > { %v237_v31 = vpop.permute.xlu0 %236  ;;  %v323_v34 = vpop.permute.xlu2 %322  ;;  %v280_v51 = vmul.f32 %v668_v36, %v659_v30 }
  0x9b   : > { %v374_v55 = vmul.f32 %v670_v37, %v323_v34  ;;  %v473_v17 = vsel %vm418_vm0, %v457_v2, 0.0  ;;  %v279_v28 = vmul.f32 %v668_v36, %v237_v31 }
  0x9d   : > { %v390_v3 = vadd.f32 %v374_v55, %v293_v56  ;;  %v298_v52 = vadd.f32 %v677_v40, %v279_v28 }
  0x9f   : > { %v406_v18 = vmax.f32 %v390_v3, 0.0 }
  0xa1   : > { %v661_v32 = vpop.permute.xlu1 %256  ;;  %v426_v55 = vsel %vm418_vm0, %v406_v18, 0.0 }
  0xa2   : > { %v666_v35 = vpop.permute.xlu0 %251  ;;  %v331_v46 = vpop.permute.xlu2 %330 }
  0xa3   : > { %v376_v4 = vmul.f32 %v670_v37, %v331_v46  ;;  %v282_v2 = vmul.f32 %v668_v36, %v666_v35 }
  0xa5   : > { %v392_v21 = vadd.f32 %v376_v4, %v295_v11 }
  0xa7   : > { %v408_v48 = vmax.f32 %v392_v21, 0.0 }
  0xaa   : > { %v680_v42 = vpop.permute.xlu0 %266  ;;  %v343_v5 = vpop.permute.xlu2 %342 }
  0xab   : > { %v307_v44 = vpop.permute.xlu1 %306 }
  0xac   : > { %v370_v47 = vmul.f32 %v670_v37, %v307_v44  ;;  %v460_v44 = vmul.f32 %v406_v18, %v406_v18  ;;  %v301_v18 = vadd.f32 %v677_v40, %v282_v2 }
  0xae   : > { %v386_v49 = vadd.f32 %v370_v47, %v289_v45  ;;  %v379_v45 = vmul.f32 %v670_v37, %v343_v5  ;;  %v479_v59 = vsel %vm418_vm0, %v460_v44, 0.0 }
  0xb0   : > { %v402_v53 = vmax.f32 %v386_v49, 0.0 }
  0xb2   : > { %v456_v63 = vmul.f32 %v402_v53, %v402_v53  ;;  %v419_v6 = vsel %vm418_vm0, %v402_v53, 0.0  ;;  %v355_v56 = vpop.permute.xlu2 %354 }
  0xb3   : > { %v319_v60 = vpop.permute.xlu1 %318  ;;  %v315_v61 = vpop.permute.xlu0 %314  ;;  %v421_v19 = vadd.f32 %v420_v12, %v419_v6  ;;  %v382_v11 = vmul.f32 %v670_v37, %v355_v56 }
  0xb4   : > { %v373_v0 = vmul.f32 %v670_v37, %v319_v60  ;;  %v372_v1 = vmul.f32 %v670_v37, %v315_v61  ;;  %v472_v13 = vsel %vm418_vm0, %v456_v63, 0.0  ;;  %v395_v60 = vadd.f32 %v379_v45, %v298_v52 }
  0xb5   : > { %v474_v29 = vadd.f32 %v473_v17, %v472_v13  ;;  %v283_v17 = vmul.f32 %v668_v36, %v661_v32 }
  0xb6   : > { %v389_v7 = vadd.f32 %v373_v0, %v292_v62  ;;  %v388_v8 = vadd.f32 %v372_v1, %v291_v58  ;;  %v281_v58 = vmul.f32 %v668_v36, %v655_v23  ;;  %v462_v62 = vmul.f32 %v408_v48, %v408_v48 }
  0xb7   : > { %v299_v1 = vadd.f32 %v677_v40, %v280_v51  ;;  %v430_v23 = vsel %vm418_vm0, %v408_v48, 0.0  ;;  %v411_v10 = vmax.f32 %v395_v60, 0.0  ;;  %v302_v32 = vadd.f32 %v677_v40, %v283_v17 }
  0xb8   : > { %v405_v14 = vmax.f32 %v389_v7, 0.0  ;;  %v404_v15 = vmax.f32 %v388_v8, 0.0 }
  0xba   : > { %v459_v22 = vmul.f32 %v405_v14, %v405_v14  ;;  %v422_v24 = vsel %vm418_vm0, %v404_v15, 0.0  ;;  %v458_v25 = vmul.f32 %v404_v15, %v404_v15  ;;  %v424_v39 = vsel %vm418_vm0, %v405_v14, 0.0 }
  0xbb   : > { %v423_v33 = vadd.f32 %v422_v24, %v421_v19  ;;  %v327_v34 = vpop.permute.xlu1 %326  ;;  %v335_v38 = vpop.permute.xlu0 %334  ;;  %v483_v14 = vsel %vm418_vm0, %v462_v62, 0.0  ;;  %v300_v24 = vadd.f32 %v677_v40, %v281_v58  ;;  %v284_v58 = vmul.f32 %v668_v36, %v657_v26 }
  0xbc   : > { %v475_v20 = vsel %vm418_vm0, %v458_v25, 0.0  ;;  %v375_v41 = vmul.f32 %v670_v37, %v327_v34  ;;  %v377_v43 = vmul.f32 %v670_v37, %v335_v38  ;;  %v477_v31 = vsel %vm418_vm0, %v459_v22, 0.0 }
  0xbd   : > { %v425_v46 = vadd.f32 %v424_v39, %v423_v33  ;;  %v476_v47 = vadd.f32 %v475_v20, %v474_v29  ;;  %v465_v25 = vmul.f32 %v411_v10, %v411_v10  ;;  %v367_v29 = vpop.permute.xlu2 %366  ;;  %v285_v20 = vmul.f32 %v668_v36, %v680_v42 }
  0xbe   : > { %v391_v49 = vadd.f32 %v375_v41, %v294_v9  ;;  %v393_v50 = vadd.f32 %v377_v43, %v296_v27  ;;  %v398_v27 = vadd.f32 %v382_v11, %v301_v18 }
  0xbf   : > { %v478_v53 = vadd.f32 %v477_v31, %v476_v47  ;;  %v427_v61 = vadd.f32 %v426_v55, %v425_v46  ;;  %v436_v46 = vsel %vm418_vm0, %v411_v10, 0.0  ;;  %v304_v56 = vadd.f32 %v677_v40, %v285_v20 }
  0xc0   : > { %v407_v57 = vmax.f32 %v391_v49, 0.0  ;;  %v409_v0 = vmax.f32 %v393_v50, 0.0  ;;  %v414_v49 = vmax.f32 %v398_v27, 0.0  ;;  %v385_v50 = vmul.f32 %v670_v37, %v367_v29 }
  0xc1   : > { %v480_v4 = vadd.f32 %v479_v59, %v478_v53  ;;  %v489_v53 = vsel %vm418_vm0, %v465_v25, 0.0 }
  0xc2   : > { %v428_v63 = vsel %vm418_vm0, %v407_v57, 0.0  ;;  %v461_v30 = vmul.f32 %v407_v57, %v407_v57  ;;  %v463_v35 = vmul.f32 %v409_v0, %v409_v0  ;;  %v432_v21 = vsel %vm418_vm0, %v409_v0, 0.0 }
  0xc3   : > { %v429_v3 = vadd.f32 %v428_v63, %v427_v61  ;;  %v339_v5 = vpop.permute.xlu1 %338  ;;  %v347_v6 = vpop.permute.xlu0 %346  ;;  %v468_v61 = vmul.f32 %v414_v49, %v414_v49  ;;  %v401_v62 = vadd.f32 %v385_v50, %v304_v56 }
  0xc4   : > { %v481_v7 = vsel %vm418_vm0, %v461_v30, 0.0  ;;  %v378_v8 = vmul.f32 %v670_v37, %v339_v5  ;;  %v380_v9 = vmul.f32 %v670_v37, %v347_v6  ;;  %v485_v33 = vsel %vm418_vm0, %v463_v35, 0.0 }
  0xc5   : > { %v482_v12 = vadd.f32 %v481_v7, %v480_v4  ;;  %v431_v13 = vadd.f32 %v430_v23, %v429_v3  ;;  %v303_v6 = vadd.f32 %v677_v40, %v284_v58  ;;  %v442_v23 = vsel %vm418_vm0, %v414_v49, 0.0 }
  0xc6   : > { %v394_v15 = vadd.f32 %v378_v8, %v297_v54  ;;  %v396_v16 = vadd.f32 %v380_v9, %v299_v1  ;;  %v495_v9 = vsel %vm418_vm0, %v468_v61, 0.0  ;;  %v417_v10 = vmax.f32 %v401_v62, 0.0 }
  0xc7   : > { %v484_v19 = vadd.f32 %v483_v14, %v482_v12  ;;  %v433_v28 = vadd.f32 %v432_v21, %v431_v13 }
  0xc8   : > { %v410_v22 = vmax.f32 %v394_v15, 0.0  ;;  %v412_v39 = vmax.f32 %v396_v16, 0.0  ;;  %v471_v40 = vmul.f32 %v417_v10, %v417_v10  ;;  %v448_v21 = vsel %vm418_vm0, %v417_v10, 0.0 }
  0xc9   : > { %v486_v41 = vadd.f32 %v485_v33, %v484_v19 }
  0xca   : > { %v434_v34 = vsel %vm418_vm0, %v410_v22, 0.0  ;;  %v464_v38 = vmul.f32 %v410_v22, %v410_v22  ;;  %v466_v42 = vmul.f32 %v412_v39, %v412_v39  ;;  %v438_v59 = vsel %vm418_vm0, %v412_v39, 0.0 }
  0xcb   : > { %v435_v43 = vadd.f32 %v434_v34, %v433_v28  ;;  %v351_v44 = vpop.permute.xlu1 %350  ;;  %v359_v45 = vpop.permute.xlu0 %358  ;;  %v501_v27 = vsel %vm418_vm0, %v471_v40, 0.0 }
  0xcc   : > { %v487_v47 = vsel %vm418_vm0, %v464_v38, 0.0  ;;  %v381_v48 = vmul.f32 %v670_v37, %v351_v44  ;;  %v383_v31 = vmul.f32 %v670_v37, %v359_v45  ;;  %v491_v30 = vsel %vm418_vm0, %v466_v42, 0.0 }
  0xcd   : > { %v488_v51 = vadd.f32 %v487_v47, %v486_v41  ;;  %v437_v52 = vadd.f32 %v436_v46, %v435_v43 }
  0xce   : > { %v397_v54 = vadd.f32 %v381_v48, %v300_v24  ;;  %v399_v55 = vadd.f32 %v383_v31, %v302_v32 }
  0xcf   : > { %v490_v57 = vadd.f32 %v489_v53, %v488_v51  ;;  %v439_v63 = vadd.f32 %v438_v59, %v437_v52 }
  0xd0   : > { %v413_v60 = vmax.f32 %v397_v54, 0.0  ;;  %v415_v2 = vmax.f32 %v399_v55, 0.0 }
  0xd1   : > { %v492_v3 = vadd.f32 %v491_v30, %v490_v57 }
  0xd2   : > { %v440_v0 = vsel %vm418_vm0, %v413_v60, 0.0  ;;  %v467_v1 = vmul.f32 %v413_v60, %v413_v60  ;;  %v469_v11 = vmul.f32 %v415_v2, %v415_v2  ;;  %v444_v14 = vsel %vm418_vm0, %v415_v2, 0.0 }
  0xd3   : > { %v441_v4 = vadd.f32 %v440_v0, %v439_v63  ;;  %v363_v5 = vpop.permute.xlu1 %362 }
  0xd4   : > { %v493_v26 = vsel %vm418_vm0, %v467_v1, 0.0  ;;  %v384_v36 = vmul.f32 %v670_v37, %v363_v5  ;;  %v497_v16 = vsel %vm418_vm0, %v469_v11, 0.0 }
  0xd5   : > { %v494_v7 = vadd.f32 %v493_v26, %v492_v3  ;;  %v443_v8 = vadd.f32 %v442_v23, %v441_v4 }
  0xd6   : > { %v400_v12 = vadd.f32 %v384_v36, %v303_v6 }
  0xd7   : > { %v496_v13 = vadd.f32 %v495_v9, %v494_v7  ;;  %v445_v15 = vadd.f32 %v444_v14, %v443_v8 }
  0xd8   : > { %v416_v35 = vmax.f32 %v400_v12, 0.0 }
  0xd9   : > { %v498_v18 = vadd.f32 %v497_v16, %v496_v13 }
  0xda   : > { %v446_v17 = vsel %vm418_vm0, %v416_v35, 0.0  ;;  %v470_v37 = vmul.f32 %v416_v35, %v416_v35 }
  0xdb   : > { %v447_v19 = vadd.f32 %v446_v17, %v445_v15 }
  0xdc   : > { %v499_v22 = vsel %vm418_vm0, %v470_v37, 0.0 }
  0xdd   : > { %v449_v24 = vadd.f32 %v448_v21, %v447_v19  ;;  %v500_v25 = vadd.f32 %v499_v22, %v498_v18 }
  0xdf   : > { %v450_v28 = vrot.slane %v449_v24, 4  ;;  %v502_v29 = vadd.f32 %v501_v27, %v500_v25 }
  0xe1   : > { %v451_v33 = vadd.f32 %v450_v28, %v449_v24  ;;  %v503_v34 = vrot.slane %v502_v29, 4 }
  0xe3   : > { %v452_v38 = vrot.slane %v451_v33, 2  ;;  %v504_v39 = vadd.f32 %v503_v34, %v502_v29 }
  0xe5   : > { %v453_v32 = vadd.f32 %v452_v38, %v451_v33  ;;  %v505_v20 = vrot.slane %v504_v39, 2 }
  0xe7   : > { %v454_v41 = vrot.slane %v453_v32, 1  ;;  %v506_v43 = vadd.f32 %v505_v20, %v504_v39 }
  0xe9   : > { %v507_v44 = vrot.slane %v506_v43, 1  ;;  %v455_v45 = vadd.f32 %v454_v41, %v453_v32 }
  0xeb   : > { %v508_v46 = vadd.f32 %v507_v44, %v506_v43 }
  0xed   : > { %v510_v47 = vsel %vm509_vm1, %v455_v45, %v508_v46 }
  0xee   : > { %512 = vst.msk [vmem:[%s170_s26] sm:$0x3] %vm511_vm2, %v510_v47 }
  0xef PF: > { %s13_s12 = sadd.s32 1, %s599_s12  }
  0xf0   : > { %p10_p5 = scmp.ge.s32.totalorder %s13_s12, 4  }
  0xf2   :  { %12 = sbr.rel (!%p10_p5) target bundleno = 1 (0x1), region = 62 }

// kernel: pose_encoder.5
= control target key start
LH: loop header
LB: loop body
LE: loop exit
PB: predicated region body
PF: predicated region fallthrough
CT: control target
= control target key end

     0   :  { %s948_s21 = smov 0   ;;  %s1169_s0 = inlined_call_operand.vmem [shape: f32[256,2], index: 0, kind: input, shape index: {}]   ;;  %s1170_s1 = inlined_call_operand.vmem [shape: f32[2,64], index: 1, kind: input, shape index: {}]   ;;  %s1171_s2 = inlined_call_operand.vmem [shape: f32[1,64], index: 2, kind: input, shape index: {}]   ;;  %s1172_s3 = inlined_call_operand.vmem [shape: f32[64,128], index: 3, kind: input, shape index: {}]   ;;  %s1173_s4 = inlined_call_operand.vmem [shape: f32[1,128], index: 4, kind: input, shape index: {}]   ;;  %s1174_s5 = inlined_call_operand.vmem [shape: f32[256,128], index: 5, kind: output, shape index: {0}]   ;;  %s1175_s6 = inlined_call_operand.vmem [shape: f32[2,2,128], index: 6, kind: output, shape index: {1}]  }
   0x1 LB: > { %s954_s22 = sadd.s32 4294967295, %s909_s21   ;;  %p823_p0 = scmp.ge.s32.totalorder %s909_s21, 1  ;;  %s909_s21 = sphi %s948_s21, %s17_s21  }
   0x2   : > { %p216_p1 = scmp.lt.s32.totalorder %s909_s21, 3 }
   0x4   : > { %p217_p2 = pnand %p823_p0, %p216_p1 }
   0x5   : > { %s824_s23 = sshll.u32 (!%p217_p2), %s954_s22, 4  ;;  %p262_p4 = scmp.lt.s32.totalorder (!%p217_p2), %s954_s22, 1 }
   0x6   : > { %220 = sbr.rel (%p217_p2) target bundleno = 393 (0x189), region = 40  ;;  %p251_p3 = scmp.lt.s32.totalorder (!%p217_p2), %s824_s23, 31 }
   0xb   : > { %v911_v0 = vmov 1   ;;  %v912_v1 = vmov 0   ;;  %s1177_s23 = smov (!%p251_p3, %s824_s23), 31  ;;  %v520_v16 = vld [vmem:[%s1172_s3 + $0x38] sm:$0xff]  ;;  %v519_v18 = vld [vmem:[%s1172_s3 + $0x30] sm:$0xff]  ;;  %v518_v20 = vld [vmem:[%s1172_s3 + $0x28] sm:$0xff] }
   0xc   : > { %881 = vset.pattern.permute.xlu0 %v911_v0  ;;  %882 = vset.pattern.permute.xlu1 %v912_v1  ;;  %s825_s24 = sshll.u32 %s1177_s23, 3  ;;  %v517_v21 = vld [vmem:[%s1172_s3 + $0x20] sm:$0xff]  ;;  %v516_v22 = vld [vmem:[%s1172_s3 + $0x18] sm:$0xff]  ;;  %v515_v23 = vld [vmem:[%s1172_s3 + $0x10] sm:$0xff]  ;;  %vm525_vm0 = vcmask 523264   ;;  %s1179_s22 = smov (!%p262_p4, %s954_s22), 1 }
   0xd   : > { %883 = vset.pattern.permute.xlu2 %v912_v1  ;;  %s970_s27 = scalar_lea.vmem %s1169_s0, %s825_s24  ;;  %848 = vmatpush.msra.mxu2 %v520_v16  ;;  %v514_v25 = vld [vmem:[%s1172_s3 + $0x8] sm:$0xff]  ;;  %v513_v26 = vld [vmem:[%s1172_s3] sm:$0xff]  ;;  %s1116_s8 = scalar_lea.vmem %s1174_s5, %s825_s24  ;;  %vm729_vm1 = vcmask 1040384  }
   0xe   : > { %v267_v2 = vld [vmem:[%s970_s27 + $0x8] sm:$0xff]  ;;  %v266_v3 = vld [vmem:[%s970_s27] sm:$0xff]  ;;  %v268_v7 = vld [vmem:[%s970_s27 + $0x10] sm:$0xff]  ;;  %847 = vmatpush.msra.mxu1 %v520_v16  ;;  %582 = vmatpush.msra.mxu0 %v520_v16  ;;  %s828_s23 = sshll.u32 %s1179_s22, 1 }
   0xf   : > { %291 = vperm.xlu1 %882, %v267_v2   ;;  %401 = vperm.xlu0 %881, %v266_v3   ;;  %v274_v4 = vld [vmem:[%s970_s27 + $0x40] sm:$0xff]  ;;  %v271_v6 = vld [vmem:[%s970_s27 + $0x28] sm:$0xff]  ;;  %v276_v9 = vld [vmem:[%s970_s27 + $0x50] sm:$0xff]  ;;  %s265_s10 = scalar_lea.vmem %s1175_s6, %s828_s23 }
  0x10   : > { %326 = vperm.xlu2 %883, %v274_v4   ;;  %v270_v5 = vld [vmem:[%s970_s27 + $0x20] sm:$0xff]  ;;  %v275_v8 = vld [vmem:[%s970_s27 + $0x48] sm:$0xff]  ;;  %v277_v12 = vld [vmem:[%s970_s27 + $0x58] sm:$0xff]  ;;  %849 = vmatpush.msra.mxu3 %v520_v16 }
  0x11   : > { %v278_v10 = vld [vmem:[%s970_s27 + $0x60] sm:$0xff]  ;;  %v279_v11 = vld [vmem:[%s970_s27 + $0x68] sm:$0xff]  ;;  %v269_v13 = vld [vmem:[%s970_s27 + $0x18] sm:$0xff]  ;;  %851 = vmatpush.msra.mxu2 %v519_v18  ;;  %850 = vmatpush.msra.mxu1 %v519_v18 }
  0x12   : > { %v272_v14 = vld [vmem:[%s970_s27 + $0x30] sm:$0xff]  ;;  %v281_v15 = vld [vmem:[%s970_s27 + $0x78] sm:$0xff]  ;;  %583 = vmatpush.msra.mxu0 %v519_v18  ;;  %852 = vmatpush.msra.mxu3 %v519_v18  ;;  %v282_v27 = vld [vmem:[%s1170_s1] sm:$0x3] }
  0x13   : > { %v273_v17 = vld [vmem:[%s970_s27 + $0x38] sm:$0xff]  ;;  %v280_v19 = vld [vmem:[%s970_s27 + $0x70] sm:$0xff]  ;;  %854 = vmatpush.msra.mxu2 %v518_v20  ;;  %853 = vmatpush.msra.mxu1 %v518_v20  ;;  %v1032_v29 = vperm.slane %v282_v27, 0  ;;  %v1038_v31 = vld [vmem:[%s1171_s2] ss:$0 sm:$0xff]  ;;  %v1041_v33 = vperm.slane %v282_v27, 1 }
  0x14   : > { %584 = vmatpush.msra.mxu0 %v518_v20  ;;  %855 = vmatpush.msra.mxu3 %v518_v20 }
  0x15   : > { %857 = vmatpush.msra.mxu2 %v517_v21  ;;  %856 = vmatpush.msra.mxu1 %v517_v21 }
  0x16   : > { %585 = vmatpush.msra.mxu0 %v517_v21  ;;  %858 = vmatpush.msra.mxu3 %v517_v21 }
  0x17   : > { %306 = vperm.xlu1 %882, %v270_v5   ;;  %421 = vperm.xlu0 %881, %v271_v6  }
  0x18   : > { %884 = vset.pattern.permute.xlu2 %v911_v0  ;;  %860 = vmatpush.msra.mxu2 %v516_v22 }
  0x19   : > { %405 = vperm.xlu2 %884, %v267_v2   ;;  %859 = vmatpush.msra.mxu1 %v516_v22 }
  0x1a   : > { %863 = vmatpush.msra.mxu2 %v515_v23  ;;  %586 = vmatpush.msra.mxu0 %v516_v22 }
  0x1b   : > { %862 = vmatpush.msra.mxu1 %v515_v23  ;;  %861 = vmatpush.msra.mxu3 %v516_v22 }
  0x1c   : > { %866 = vmatpush.msra.mxu2 %v514_v25  ;;  %587 = vmatpush.msra.mxu0 %v515_v23 }
  0x1d   : > { %865 = vmatpush.msra.mxu1 %v514_v25  ;;  %864 = vmatpush.msra.mxu3 %v515_v23 }
  0x1e   : > { %869 = vmatpush.msra.mxu2 %v513_v26  ;;  %588 = vmatpush.msra.mxu0 %v514_v25 }
  0x1f   : > { %885 = vset.pattern.permute.xlu1 %v911_v0  ;;  %889 = vset.pattern.permute.xlu0 %v912_v1 }
  0x20   : > { %417 = vperm.xlu1 %885, %v270_v5   ;;  %286 = vperm.xlu0 %889, %v266_v3  }
  0x21   : > { %433 = vperm.xlu2 %884, %v274_v4   ;;  %868 = vmatpush.msra.mxu1 %v513_v26 }
  0x22   : > { %589 = vmatpush.msra.mxu0 %v513_v26  ;;  %867 = vmatpush.msra.mxu3 %v514_v25 }
  0x24   : > { %870 = vmatpush.msra.mxu3 %v513_v26 }
  0x28   : > { %886 = vset.pattern.permute.xlu1 %v912_v1  ;;  %296 = vperm.xlu0 %889, %v268_v7  }
  0x29   : > { %311 = vperm.xlu1 %886, %v271_v6   ;;  %887 = vset.pattern.permute.xlu2 %v912_v1 }
  0x2a   : > { %331 = vperm.xlu2 %887, %v275_v8  }
  0x30   : > { %336 = vperm.xlu0 %889, %v276_v9  }
  0x31   : > { %346 = vperm.xlu1 %886, %v278_v10  }
  0x32   : > { %888 = vset.pattern.permute.xlu2 %v911_v0 }
  0x33   : > { %409 = vperm.xlu2 %888, %v268_v7  }
  0x38   : > { %895 = vset.pattern.permute.xlu0 %v911_v0 }
  0x39   : > { %890 = vset.pattern.permute.xlu1 %v911_v0  ;;  %453 = vperm.xlu0 %895, %v279_v11  }
  0x3a   : > { %437 = vperm.xlu1 %890, %v275_v8  }
  0x3b   : > { %449 = vperm.xlu2 %888, %v278_v10  }
  0x41   : > { %445 = vperm.xlu0 %895, %v277_v12  }
  0x42   : > { %891 = vset.pattern.permute.xlu1 %v912_v1 }
  0x43   : > { %301 = vperm.xlu1 %891, %v269_v13   ;;  %892 = vset.pattern.permute.xlu2 %v912_v1 }
  0x44   : > { %316 = vperm.xlu2 %892, %v272_v14  }
  0x49   : > { %461 = vperm.xlu0 %895, %v281_v15  }
  0x4b   : > { %351 = vperm.xlu1 %891, %v279_v11  }
  0x4c   : > { %893 = vset.pattern.permute.xlu2 %v911_v0 }
  0x4d   : > { %413 = vperm.xlu2 %893, %v269_v13  }
  0x53   : > { %894 = vset.pattern.permute.xlu1 %v911_v0 }
  0x54   : > { %425 = vperm.xlu1 %894, %v272_v14  }
  0x55   : > { %441 = vperm.xlu2 %893, %v276_v9  }
  0x5c   : > { %896 = vset.pattern.permute.xlu1 %v912_v1 }
  0x5d   : > { %321 = vperm.xlu1 %896, %v273_v17   ;;  %897 = vset.pattern.permute.xlu2 %v912_v1 }
  0x5e   : > { %341 = vperm.xlu2 %897, %v277_v12  }
  0x65   : > { %356 = vperm.xlu1 %896, %v280_v19  }
  0x66   : > { %898 = vset.pattern.permute.xlu2 %v911_v0 }
  0x67   : > { %429 = vperm.xlu2 %898, %v273_v17  }
  0x6a   : > { %v327_v24 = vpop.permute.xlu2 %326 }
  0x6b   : > { %v373_v30 = vmul.f32 %v1032_v29, %v327_v24 }
  0x6d   : > { %899 = vset.pattern.permute.xlu1 %v911_v0  ;;  %v392_v32 = vadd.f32 %v1038_v31, %v373_v30 }
  0x6e   : > { %457 = vperm.xlu1 %899, %v280_v19  }
  0x6f   : > { %900 = vset.pattern.permute.xlu2 %v912_v1 }
  0x70   : > { %361 = vperm.xlu2 %900, %v281_v15  }
  0x73   : > { %v406_v28 = vpop.permute.xlu2 %405 }
  0x74   : > { %v466_v57 = vmul.f32 %v1041_v33, %v406_v28 }
  0x7b   : > { %v434_v34 = vpop.permute.xlu2 %433 }
  0x7c   : > { %v473_v35 = vmul.f32 %v1041_v33, %v434_v34 }
  0x7e   : > { %v489_v36 = vadd.f32 %v473_v35, %v392_v32 }
  0x80   : > { %v505_v37 = vmax.f32 %v489_v36, 0.0 }
  0x81   : > { %v292_v38 = vpop.permute.xlu1 %291  ;;  %v402_v39 = vpop.permute.xlu0 %401 }
  0x82   : > { %837 = vmatmul.msk.f32.vlgmr.msra.gmra.mxu2 %vm525_vm0, %v505_v37  ;;  %v465_v47 = vmul.f32 %v1041_v33, %v402_v39  ;;  %v366_v51 = vmul.f32 %v1032_v29, %v292_v38 }
  0x84   : > { %v332_v40 = vpop.permute.xlu2 %331  ;;  %v385_v58 = vadd.f32 %v1038_v31, %v366_v51 }
  0x85   : > { %v374_v18 = vmul.f32 %v1032_v29, %v332_v40 }
  0x86   : > { %v482_v1 = vadd.f32 %v466_v57, %v385_v58 }
  0x87   : > { %v393_v22 = vadd.f32 %v1038_v31, %v374_v18 }
  0x88   : > { %v498_v7 = vmax.f32 %v482_v1, 0.0 }
  0x89   : > { %v307_v41 = vpop.permute.xlu1 %306  ;;  %v422_v42 = vpop.permute.xlu0 %421 }
  0x8a   : > { %v369_v44 = vmul.f32 %v1032_v29, %v307_v41  ;;  %v470_v63 = vmul.f32 %v1041_v33, %v422_v42 }
  0x8c   : > { %v388_v48 = vadd.f32 %v1038_v31, %v369_v44 }
  0x8d   : > { %v410_v43 = vpop.permute.xlu2 %409 }
  0x8e   : > { %v467_v4 = vmul.f32 %v1041_v33, %v410_v43 }
  0x92   : > { %v418_v45 = vpop.permute.xlu1 %417  ;;  %v287_v46 = vpop.permute.xlu0 %286 }
  0x93   : > { %v469_v49 = vmul.f32 %v1041_v33, %v418_v45  ;;  %v365_v50 = vmul.f32 %v1032_v29, %v287_v46 }
  0x95   : > { %v485_v52 = vadd.f32 %v469_v49, %v388_v48  ;;  %v384_v53 = vadd.f32 %v1038_v31, %v365_v50  ;;  %v450_v54 = vpop.permute.xlu2 %449 }
  0x96   : > { %v477_v12 = vmul.f32 %v1041_v33, %v450_v54 }
  0x97   : > { %v501_v55 = vmax.f32 %v485_v52, 0.0  ;;  %v481_v56 = vadd.f32 %v465_v47, %v384_v53 }
  0x99   : > { %833 = vmatmul.msk.f32.vlgmr.msra.gmra.mxu1 %vm525_vm0, %v501_v55  ;;  %v497_v59 = vmax.f32 %v481_v56, 0.0 }
  0x9a   : > { %v297_v60 = vpop.permute.xlu0 %296 }
  0x9b   : > { %v312_v61 = vpop.permute.xlu1 %311  ;;  %829 = vmatmul.msk.f32.vlgmr.msra.gmra.mxu0 %vm525_vm0, %v497_v59  ;;  %v367_v62 = vmul.f32 %v1032_v29, %v297_v60 }
  0x9c   : > { %v370_v0 = vmul.f32 %v1032_v29, %v312_v61 }
  0x9d   : > { %v386_v5 = vadd.f32 %v1038_v31, %v367_v62 }
  0x9e   : > { %v389_v2 = vadd.f32 %v1038_v31, %v370_v0  ;;  %v317_v3 = vpop.permute.xlu2 %316 }
  0x9f   : > { %v483_v10 = vadd.f32 %v467_v4, %v386_v5  ;;  %v371_v53 = vmul.f32 %v1032_v29, %v317_v3 }
  0xa0   : > { %v486_v6 = vadd.f32 %v470_v63, %v389_v2 }
  0xa1   : > { %v499_v15 = vmax.f32 %v483_v10, 0.0  ;;  %v390_v56 = vadd.f32 %v1038_v31, %v371_v53 }
  0xa2   : > { %v502_v8 = vmax.f32 %v486_v6, 0.0  ;;  %v337_v14 = vpop.permute.xlu0 %336 }
  0xa3   : > { %v347_v9 = vpop.permute.xlu1 %346  ;;  %830 = vmatmul.msk.f32.gmra.mxu0 %vm525_vm0, %v498_v7  ;;  %v375_v20 = vmul.f32 %v1032_v29, %v337_v14 }
  0xa4   : > { %v377_v11 = vmul.f32 %v1032_v29, %v347_v9  ;;  %834 = vmatmul.msk.f32.gmra.mxu1 %vm525_vm0, %v502_v8 }
  0xa5   : > { %v394_v25 = vadd.f32 %v1038_v31, %v375_v20 }
  0xa6   : > { %v396_v13 = vadd.f32 %v1038_v31, %v377_v11 }
  0xa7   : > { %v414_v16 = vpop.permute.xlu2 %413 }
  0xa8   : > { %v493_v17 = vadd.f32 %v477_v12, %v396_v13  ;;  %v468_v36 = vmul.f32 %v1041_v33, %v414_v16 }
  0xaa   : > { %v509_v19 = vmax.f32 %v493_v17, 0.0 }
  0xab   : > { %831 = vmatmul.msk.f32.gmra.mxu0 %vm525_vm0, %v499_v15  ;;  %v454_v28 = vpop.permute.xlu0 %453 }
  0xac   : > { %841 = vmatmul.msk.f32.vlgmr.msra.gmra.mxu3 %vm525_vm0, %v509_v19  ;;  %v438_v21 = vpop.permute.xlu1 %437  ;;  %v478_v49 = vmul.f32 %v1041_v33, %v454_v28 }
  0xad   : > { %v474_v23 = vmul.f32 %v1041_v33, %v438_v21 }
  0xaf   : > { %v490_v24 = vadd.f32 %v474_v23, %v393_v22  ;;  %v442_v26 = vpop.permute.xlu2 %441 }
  0xb0   : > { %v475_v27 = vmul.f32 %v1041_v33, %v442_v26 }
  0xb1   : > { %v506_v30 = vmax.f32 %v490_v24, 0.0 }
  0xb2   : > { %v491_v32 = vadd.f32 %v475_v27, %v394_v25 }
  0xb3   : > { %838 = vmatmul.msk.f32.gmra.mxu2 %vm525_vm0, %v506_v30  ;;  %v446_v40 = vpop.permute.xlu0 %445 }
  0xb4   : > { %v507_v37 = vmax.f32 %v491_v32, 0.0  ;;  %v476_v42 = vmul.f32 %v1041_v33, %v446_v40 }
  0xb5   : > { %v302_v34 = vpop.permute.xlu1 %301 }
  0xb6   : > { %v368_v35 = vmul.f32 %v1032_v29, %v302_v34 }
  0xb8   : > { %v387_v38 = vadd.f32 %v1038_v31, %v368_v35  ;;  %v342_v39 = vpop.permute.xlu2 %341 }
  0xb9   : > { %v376_v41 = vmul.f32 %v1032_v29, %v342_v39 }
  0xba   : > { %v484_v43 = vadd.f32 %v468_v36, %v387_v38 }
  0xbb   : > { %839 = vmatmul.msk.f32.gmra.mxu2 %vm525_vm0, %v507_v37  ;;  %v395_v44 = vadd.f32 %v1038_v31, %v376_v41  ;;  %v462_v10 = vpop.permute.xlu0 %461 }
  0xbc   : > { %v500_v45 = vmax.f32 %v484_v43, 0.0  ;;  %v480_v13 = vmul.f32 %v1041_v33, %v462_v10 }
  0xbd   : > { %v352_v46 = vpop.permute.xlu1 %351  ;;  %v492_v47 = vadd.f32 %v476_v42, %v395_v44 }
  0xbe   : > { %v378_v48 = vmul.f32 %v1032_v29, %v352_v46  ;;  %832 = vmatmul.msk.f32.gmra.mxu0 %vm525_vm0, %v500_v45 }
  0xbf   : > { %v508_v50 = vmax.f32 %v492_v47, 0.0 }
  0xc0   : > { %v397_v51 = vadd.f32 %v1038_v31, %v378_v48 }
  0xc1   : > { %v430_v60 = vpop.permute.xlu2 %429 }
  0xc2   : > { %v494_v52 = vadd.f32 %v478_v49, %v397_v51  ;;  %v472_v62 = vmul.f32 %v1041_v33, %v430_v60 }
  0xc3   : > { %840 = vmatmul.msk.f32.gmra.mxu2 %vm525_vm0, %v508_v50 }
  0xc4   : > { %v510_v54 = vmax.f32 %v494_v52, 0.0 }
  0xc6   : > { %v426_v55 = vpop.permute.xlu1 %425  ;;  %842 = vmatmul.msk.f32.gmra.mxu3 %vm525_vm0, %v510_v54 }
  0xc7   : > { %v471_v57 = vmul.f32 %v1041_v33, %v426_v55 }
  0xc9   : > { %v487_v58 = vadd.f32 %v471_v57, %v390_v56 }
  0xca   : > { %v362_v5 = vpop.permute.xlu2 %361 }
  0xcb   : > { %v503_v59 = vmax.f32 %v487_v58, 0.0  ;;  %v380_v7 = vmul.f32 %v1032_v29, %v362_v5 }
  0xcd   : > { %835 = vmatmul.msk.f32.gmra.mxu1 %vm525_vm0, %v503_v59  ;;  %v399_v12 = vadd.f32 %v1038_v31, %v380_v7 }
  0xcf   : > { %v322_v61 = vpop.permute.xlu1 %321  ;;  %v496_v15 = vadd.f32 %v480_v13, %v399_v12 }
  0xd0   : > { %v372_v63 = vmul.f32 %v1032_v29, %v322_v61 }
  0xd1   : > { %v512_v16 = vmax.f32 %v496_v15, 0.0 }
  0xd2   : > { %v391_v0 = vadd.f32 %v1038_v31, %v372_v63 }
  0xd4   : > { %v488_v1 = vadd.f32 %v472_v62, %v391_v0 }
  0xd6   : > { %v504_v2 = vmax.f32 %v488_v1, 0.0 }
  0xd7   : > { %v357_v3 = vpop.permute.xlu1 %356 }
  0xd8   : > { %836 = vmatmul.msk.f32.gmra.mxu1 %vm525_vm0, %v504_v2  ;;  %v379_v4 = vmul.f32 %v1032_v29, %v357_v3  ;;  %v1108_v29 = vld [vmem:[%s1173_s4] ss:$0 sm:$0xff] }
  0xda   : > { %v398_v8 = vadd.f32 %v1038_v31, %v379_v4 }
  0xe0   : > { %v458_v6 = vpop.permute.xlu1 %457 }
  0xe1   : > { %v479_v9 = vmul.f32 %v1041_v33, %v458_v6 }
  0xe3   : > { %v495_v11 = vadd.f32 %v479_v9, %v398_v8 }
  0xe5   : > { %v511_v14 = vmax.f32 %v495_v11, 0.0 }
  0xe7   : > { %843 = vmatmul.msk.f32.gmra.mxu3 %vm525_vm0, %v511_v14 }
  0xef   : > { %844 = vmatmul.msk.f32.gmra.mxu3 %vm525_vm0, %v512_v16 }
 0x105   : > { %v615_v17 = vpop.f32.mrf.mxu2 }
 0x106   : > { %v616_v18 = vadd.f32 %v1108_v29, %v615_v17 }
 0x108   : > { %v1118_v31 = vmax.f32 %v616_v18, 0.0 }
 0x10a   : > { %663 = vst [vmem:[%s1116_s8 + $0x40] sm:$0xff] %v1118_v31 }
 0x116   : > { %v603_v33 = vpop.f32.mrf.mxu1 }
 0x117   : > { %v604_v19 = vadd.f32 %v1108_v29, %v603_v33 }
 0x118   : > { %v591_v20 = vpop.f32.mrf.mxu0 }
 0x119   : > { %v643_v21 = vmax.f32 %v604_v19, 0.0  ;;  %v592_v22 = vadd.f32 %v1108_v29, %v591_v20  ;;  %v700_v19 = vmul.f32 %v1118_v31, %v1118_v31 }
 0x11b   : > { %659 = vst [vmem:[%s1116_s8 + $0x20] sm:$0xff] %v643_v21  ;;  %v639_v23 = vmax.f32 %v592_v22, 0.0  ;;  %v696_v5 = vmul.f32 %v643_v21, %v643_v21 }
 0x11d   : > { %655 = vst [vmem:[%s1116_s8] sm:$0xff] %v639_v23  ;;  %v692_v55 = vmul.f32 %v639_v23, %v639_v23 }
 0x120   : > { %v594_v24 = vpop.f32.mrf.mxu0 }
 0x121   : > { %v595_v25 = vadd.f32 %v1108_v29, %v594_v24  ;;  %v606_v26 = vpop.f32.mrf.mxu1 }
 0x122   : > { %v607_v27 = vadd.f32 %v1108_v29, %v606_v26 }
 0x123   : > { %v640_v28 = vmax.f32 %v595_v25, 0.0 }
 0x124   : > { %v644_v30 = vmax.f32 %v607_v27, 0.0 }
 0x125   : > { %656 = vst [vmem:[%s1116_s8 + $0x8] sm:$0xff] %v640_v28  ;;  %v671_v43 = vadd.f32 %v640_v28, %v639_v23  ;;  %v693_v56 = vmul.f32 %v640_v28, %v640_v28 }
 0x126   : > { %660 = vst [vmem:[%s1116_s8 + $0x28] sm:$0xff] %v644_v30  ;;  %v697_v9 = vmul.f32 %v644_v30, %v644_v30 }
 0x127   : > { %v708_v0 = vadd.f32 %v693_v56, %v692_v55 }
 0x128   : > { %v597_v32 = vpop.f32.mrf.mxu0 }
 0x129   : > { %v598_v34 = vadd.f32 %v1108_v29, %v597_v32 }
 0x12b   : > { %v641_v35 = vmax.f32 %v598_v34, 0.0 }
 0x12d   : > { %657 = vst [vmem:[%s1116_s8 + $0x10] sm:$0xff] %v641_v35  ;;  %v672_v45 = vadd.f32 %v671_v43, %v641_v35  ;;  %v694_v61 = vmul.f32 %v641_v35, %v641_v35 }
 0x12f   : > { %v627_v36 = vpop.f32.mrf.mxu3  ;;  %v709_v3 = vadd.f32 %v708_v0, %v694_v61 }
 0x130   : > { %v628_v37 = vadd.f32 %v1108_v29, %v627_v36 }
 0x132   : > { %v1133_v38 = vmax.f32 %v628_v37, 0.0 }
 0x134   : > { %667 = vst [vmem:[%s1116_s8 + $0x60] sm:$0xff] %v1133_v38  ;;  %v704_v36 = vmul.f32 %v1133_v38, %v1133_v38 }
 0x136   : > { %v618_v39 = vpop.f32.mrf.mxu2 }
 0x137   : > { %v619_v40 = vadd.f32 %v1108_v29, %v618_v39 }
 0x139   : > { %v648_v41 = vmax.f32 %v619_v40, 0.0 }
 0x13b   : > { %664 = vst [vmem:[%s1116_s8 + $0x48] sm:$0xff] %v648_v41  ;;  %v600_v42 = vpop.f32.mrf.mxu0  ;;  %v701_v23 = vmul.f32 %v648_v41, %v648_v41 }
 0x13c   : > { %v601_v44 = vadd.f32 %v1108_v29, %v600_v42 }
 0x13e   : > { %v642_v46 = vmax.f32 %v601_v44, 0.0  ;;  %v621_v47 = vpop.f32.mrf.mxu2 }
 0x13f   : > { %v622_v48 = vadd.f32 %v1108_v29, %v621_v47 }
 0x140   : > { %658 = vst [vmem:[%s1116_s8 + $0x18] sm:$0xff] %v642_v46  ;;  %v673_v49 = vadd.f32 %v672_v45, %v642_v46  ;;  %v695_v1 = vmul.f32 %v642_v46, %v642_v46 }
 0x141   : > { %v649_v50 = vmax.f32 %v622_v48, 0.0 }
 0x142   : > { %v674_v51 = vadd.f32 %v673_v49, %v643_v21  ;;  %v710_v4 = vadd.f32 %v709_v3, %v695_v1 }
 0x143   : > { %665 = vst [vmem:[%s1116_s8 + $0x50] sm:$0xff] %v649_v50  ;;  %v702_v26 = vmul.f32 %v649_v50, %v649_v50 }
 0x144   : > { %v675_v52 = vadd.f32 %v674_v51, %v644_v30  ;;  %v711_v6 = vadd.f32 %v710_v4, %v696_v5 }
 0x146   : > { %v624_v53 = vpop.f32.mrf.mxu2  ;;  %v712_v13 = vadd.f32 %v711_v6, %v697_v9 }
 0x147   : > { %v625_v54 = vadd.f32 %v1108_v29, %v624_v53 }
 0x149   : > { %v630_v57 = vpop.f32.mrf.mxu3  ;;  %v650_v58 = vmax.f32 %v625_v54, 0.0 }
 0x14a   : > { %v631_v59 = vadd.f32 %v1108_v29, %v630_v57  ;;  %v609_v60 = vpop.f32.mrf.mxu1 }
 0x14b   : > { %v610_v62 = vadd.f32 %v1108_v29, %v609_v60  ;;  %666 = vst [vmem:[%s1116_s8 + $0x58] sm:$0xff] %v650_v58  ;;  %v703_v27 = vmul.f32 %v650_v58, %v650_v58 }
 0x14c   : > { %v652_v63 = vmax.f32 %v631_v59, 0.0 }
 0x14d   : > { %v645_v2 = vmax.f32 %v610_v62, 0.0 }
 0x14e   : > { %668 = vst [vmem:[%s1116_s8 + $0x68] sm:$0xff] %v652_v63  ;;  %v705_v39 = vmul.f32 %v652_v63, %v652_v63 }
 0x14f   : > { %661 = vst [vmem:[%s1116_s8 + $0x30] sm:$0xff] %v645_v2  ;;  %v698_v10 = vmul.f32 %v645_v2, %v645_v2  ;;  %v676_v11 = vadd.f32 %v675_v52, %v645_v2 }
 0x151   : > { %v713_v16 = vadd.f32 %v712_v13, %v698_v10 }
 0x155   : > { %v612_v7 = vpop.f32.mrf.mxu1 }
 0x156   : > { %v613_v8 = vadd.f32 %v1108_v29, %v612_v7 }
 0x158   : > { %v646_v12 = vmax.f32 %v613_v8, 0.0 }
 0x15a   : > { %662 = vst [vmem:[%s1116_s8 + $0x38] sm:$0xff] %v646_v12  ;;  %v677_v14 = vadd.f32 %v676_v11, %v646_v12  ;;  %v699_v15 = vmul.f32 %v646_v12, %v646_v12 }
 0x15c   : > { %v678_v17 = vadd.f32 %v677_v14, %v1118_v31  ;;  %v714_v18 = vadd.f32 %v713_v16, %v699_v15 }
 0x15e   : > { %v679_v33 = vadd.f32 %v678_v17, %v648_v41  ;;  %v715_v21 = vadd.f32 %v714_v18, %v700_v19 }
 0x160   : > { %v680_v20 = vadd.f32 %v679_v33, %v649_v50  ;;  %v716_v25 = vadd.f32 %v715_v21, %v701_v23 }
 0x162   : > { %v681_v22 = vadd.f32 %v680_v20, %v650_v58  ;;  %v717_v28 = vadd.f32 %v716_v25, %v702_v26 }
 0x164   : > { %v682_v24 = vadd.f32 %v681_v22, %v1133_v38  ;;  %v718_v34 = vadd.f32 %v717_v28, %v703_v27 }
 0x166   : > { %v719_v31 = vadd.f32 %v718_v34, %v704_v36  ;;  %v683_v40 = vadd.f32 %v682_v24, %v652_v63 }
 0x168   : > { %v720_v44 = vadd.f32 %v719_v31, %v705_v39 }
 0x16a   : > { %v633_v30 = vpop.f32.mrf.mxu3 }
 0x16b   : > { %v634_v32 = vadd.f32 %v1108_v29, %v633_v30 }
 0x16d   : > { %v653_v35 = vmax.f32 %v634_v32, 0.0 }
 0x16f   : > { %669 = vst [vmem:[%s1116_s8 + $0x70] sm:$0xff] %v653_v35  ;;  %v706_v41 = vmul.f32 %v653_v35, %v653_v35  ;;  %v684_v43 = vadd.f32 %v683_v40, %v653_v35 }
 0x171   : > { %v721_v46 = vadd.f32 %v720_v44, %v706_v41 }
 0x172   : > { %v636_v37 = vpop.f32.mrf.mxu3 }
 0x173   : > { %v637_v42 = vadd.f32 %v1108_v29, %v636_v37 }
 0x175   : > { %v654_v45 = vmax.f32 %v637_v42, 0.0 }
 0x177   : > { %670 = vst [vmem:[%s1116_s8 + $0x78] sm:$0xff] %v654_v45  ;;  %v685_v47 = vadd.f32 %v684_v43, %v654_v45  ;;  %v707_v48 = vmul.f32 %v654_v45, %v654_v45 }
 0x179   : > { %v686_v49 = vrot.slane %v685_v47, 4  ;;  %v722_v50 = vadd.f32 %v721_v46, %v707_v48 }
 0x17b   : > { %v687_v38 = vadd.f32 %v686_v49, %v685_v47  ;;  %v723_v51 = vrot.slane %v722_v50, 4 }
 0x17d   : > { %v688_v52 = vrot.slane %v687_v38, 2  ;;  %v724_v53 = vadd.f32 %v723_v51, %v722_v50 }
 0x17f   : > { %v689_v54 = vadd.f32 %v688_v52, %v687_v38  ;;  %v725_v55 = vrot.slane %v724_v53, 2 }
 0x181   : > { %v690_v56 = vrot.slane %v689_v54, 1  ;;  %v726_v57 = vadd.f32 %v725_v55, %v724_v53 }
 0x183   : > { %v727_v29 = vrot.slane %v726_v57, 1  ;;  %v691_v58 = vadd.f32 %v690_v56, %v689_v54 }
 0x185   : > { %v728_v59 = vadd.f32 %v727_v29, %v726_v57 }
 0x187   : > { %v730_v60 = vsel %vm729_vm1, %v691_v58, %v728_v59 }
 0x188   : > { %731 = vst [vmem:[%s265_s10] sm:$0x3] %v730_v60 }
 0x189 PF: > { %s17_s21 = sadd.s32 1, %s909_s21  }
 0x18a   : > { %p14_p5 = scmp.ge.s32.totalorder %s17_s21, 4  }
 0x18c   :  { %16 = sbr.rel (!%p14_p5) target bundleno = 1 (0x1), region = 82 }

// kernel: pose_encoder.6
= control target key start
LH: loop header
LB: loop body
LE: loop exit
PB: predicated region body
PF: predicated region fallthrough
CT: control target
= control target key end

     0   :  { %s650_s12 = smov 0   ;;  %s881_s0 = inlined_call_operand.vmem [shape: f32[256,128], index: 0, kind: input, shape index: {}]   ;;  %s882_s1 = inlined_call_operand.vmem [shape: f32[128,256], index: 1, kind: input, shape index: {}]   ;;  %s883_s2 = inlined_call_operand.vmem [shape: f32[1,256], index: 2, kind: input, shape index: {}]   ;;  %s884_s3 = inlined_call_operand.vmem [shape: f32[2,2,256], index: 3, kind: output, shape index: {}]  }
   0x1 LB: > { %s656_s13 = sadd.s32 4294967295, %s628_s12   ;;  %p574_p0 = scmp.ge.s32.totalorder %s628_s12, 1  ;;  %s628_s12 = sphi %s650_s12, %s13_s12  }
   0x2   : > { %p138_p1 = scmp.lt.s32.totalorder %s628_s12, 3 }
   0x4   : > { %p139_p2 = pnand %p574_p0, %p138_p1 }
   0x5   : > { %s575_s21 = sshll.u32 (!%p139_p2), %s656_s13, 4  ;;  %p168_p4 = scmp.lt.s32.totalorder (!%p139_p2), %s656_s13, 1 }
   0x6   : > { %142 = sbr.rel (%p139_p2) target bundleno = 266 (0x10a), region = 32  ;;  %p163_p3 = scmp.lt.s32.totalorder (!%p139_p2), %s575_s21, 31 }
   0xb   : > { %v219_v0 = vld [vmem:[%s882_s1 + $0xf0] sm:$0xff]  ;;  %v220_v1 = vld [vmem:[%s882_s1 + $0xf8] sm:$0xff]  ;;  %v217_v2 = vld [vmem:[%s882_s1 + $0xe0] sm:$0xff]  ;;  %s886_s21 = smov (!%p163_p3, %s575_s21), 31  ;;  %s888_s13 = smov (!%p168_p4, %s656_s13), 1  ;;  %vm505_vm0 = vcmask 1040384  }
   0xc   : > { %227 = vmatpush.msra.mxu0 %v219_v0  ;;  %292 = vmatpush.msra.mxu1 %v220_v1  ;;  %v218_v3 = vld [vmem:[%s882_s1 + $0xe8] sm:$0xff]  ;;  %v215_v4 = vld [vmem:[%s882_s1 + $0xd0] sm:$0xff]  ;;  %v216_v5 = vld [vmem:[%s882_s1 + $0xd8] sm:$0xff]  ;;  %s576_s17 = sshll.u32 %s886_s21, 3  ;;  %s581_s8 = sshll.u32 %s888_s13, 2  ;;  %vm511_vm1 = vcmask 1041408  }
   0xd   : > { %582 = vmatpush.msra.mxu2 %v219_v0  ;;  %598 = vmatpush.msra.mxu3 %v220_v1  ;;  %v213_v6 = vld [vmem:[%s882_s1 + $0xc0] sm:$0xff]  ;;  %v214_v7 = vld [vmem:[%s882_s1 + $0xc8] sm:$0xff]  ;;  %v211_v8 = vld [vmem:[%s882_s1 + $0xb0] sm:$0xff]  ;;  %s754_s28 = scalar_lea.vmem %s881_s0, %s576_s17  ;;  %s172_s11 = scalar_lea.vmem %s884_s3, %s581_s8 }
   0xe   : > { %228 = vmatpush.msra.mxu0 %v217_v2  ;;  %293 = vmatpush.msra.mxu1 %v218_v3  ;;  %v212_v9 = vld [vmem:[%s882_s1 + $0xb8] sm:$0xff]  ;;  %v209_v10 = vld [vmem:[%s882_s1 + $0xa0] sm:$0xff]  ;;  %v210_v11 = vld [vmem:[%s882_s1 + $0xa8] sm:$0xff] }
   0xf   : > { %583 = vmatpush.msra.mxu2 %v217_v2  ;;  %599 = vmatpush.msra.mxu3 %v218_v3  ;;  %v207_v12 = vld [vmem:[%s882_s1 + $0x90] sm:$0xff]  ;;  %v208_v13 = vld [vmem:[%s882_s1 + $0x98] sm:$0xff]  ;;  %v205_v14 = vld [vmem:[%s882_s1 + $0x80] sm:$0xff] }
  0x10   : > { %229 = vmatpush.msra.mxu0 %v215_v4  ;;  %294 = vmatpush.msra.mxu1 %v216_v5  ;;  %v206_v15 = vld [vmem:[%s882_s1 + $0x88] sm:$0xff]  ;;  %v203_v16 = vld [vmem:[%s882_s1 + $0x70] sm:$0xff]  ;;  %v204_v17 = vld [vmem:[%s882_s1 + $0x78] sm:$0xff] }
  0x11   : > { %584 = vmatpush.msra.mxu2 %v215_v4  ;;  %600 = vmatpush.msra.mxu3 %v216_v5  ;;  %v201_v18 = vld [vmem:[%s882_s1 + $0x60] sm:$0xff]  ;;  %v202_v19 = vld [vmem:[%s882_s1 + $0x68] sm:$0xff]  ;;  %v199_v20 = vld [vmem:[%s882_s1 + $0x50] sm:$0xff] }
  0x12   : > { %230 = vmatpush.msra.mxu0 %v213_v6  ;;  %295 = vmatpush.msra.mxu1 %v214_v7  ;;  %v200_v21 = vld [vmem:[%s882_s1 + $0x58] sm:$0xff]  ;;  %v197_v22 = vld [vmem:[%s882_s1 + $0x40] sm:$0xff]  ;;  %v198_v23 = vld [vmem:[%s882_s1 + $0x48] sm:$0xff] }
  0x13   : > { %585 = vmatpush.msra.mxu2 %v213_v6  ;;  %601 = vmatpush.msra.mxu3 %v214_v7  ;;  %v195_v24 = vld [vmem:[%s882_s1 + $0x30] sm:$0xff]  ;;  %v196_v25 = vld [vmem:[%s882_s1 + $0x38] sm:$0xff]  ;;  %v193_v26 = vld [vmem:[%s882_s1 + $0x20] sm:$0xff] }
  0x14   : > { %231 = vmatpush.msra.mxu0 %v211_v8  ;;  %296 = vmatpush.msra.mxu1 %v212_v9  ;;  %v194_v27 = vld [vmem:[%s882_s1 + $0x28] sm:$0xff]  ;;  %v191_v28 = vld [vmem:[%s882_s1 + $0x10] sm:$0xff]  ;;  %v192_v29 = vld [vmem:[%s882_s1 + $0x18] sm:$0xff] }
  0x15   : > { %586 = vmatpush.msra.mxu2 %v211_v8  ;;  %602 = vmatpush.msra.mxu3 %v212_v9  ;;  %v189_v30 = vld [vmem:[%s882_s1] sm:$0xff]  ;;  %v190_v31 = vld [vmem:[%s882_s1 + $0x8] sm:$0xff]  ;;  %v175_v36 = vld [vmem:[%s754_s28 + $0x10] sm:$0xff] }
  0x16   : > { %232 = vmatpush.msra.mxu0 %v209_v10  ;;  %297 = vmatpush.msra.mxu1 %v210_v11  ;;  %v173_v32 = vld [vmem:[%s754_s28] sm:$0xff]  ;;  %v174_v34 = vld [vmem:[%s754_s28 + $0x8] sm:$0xff]  ;;  %v183_v37 = vld [vmem:[%s754_s28 + $0x50] sm:$0xff] }
  0x17   : > { %587 = vmatpush.msra.mxu2 %v209_v10  ;;  %603 = vmatpush.msra.mxu3 %v210_v11  ;;  %v181_v33 = vld [vmem:[%s754_s28 + $0x40] sm:$0xff]  ;;  %v182_v35 = vld [vmem:[%s754_s28 + $0x48] sm:$0xff]  ;;  %v176_v38 = vld [vmem:[%s754_s28 + $0x18] sm:$0xff] }
  0x18   : > { %233 = vmatpush.msra.mxu0 %v207_v12  ;;  %298 = vmatpush.msra.mxu1 %v208_v13  ;;  %v184_v39 = vld [vmem:[%s754_s28 + $0x58] sm:$0xff]  ;;  %v177_v40 = vld [vmem:[%s754_s28 + $0x20] sm:$0xff]  ;;  %v178_v42 = vld [vmem:[%s754_s28 + $0x28] sm:$0xff] }
  0x19   : > { %588 = vmatpush.msra.mxu2 %v207_v12  ;;  %604 = vmatpush.msra.mxu3 %v208_v13  ;;  %v185_v41 = vld [vmem:[%s754_s28 + $0x60] sm:$0xff]  ;;  %v186_v43 = vld [vmem:[%s754_s28 + $0x68] sm:$0xff]  ;;  %v179_v44 = vld [vmem:[%s754_s28 + $0x30] sm:$0xff] }
  0x1a   : > { %234 = vmatpush.msra.mxu0 %v205_v14  ;;  %299 = vmatpush.msra.mxu1 %v206_v15  ;;  %v187_v45 = vld [vmem:[%s754_s28 + $0x70] sm:$0xff]  ;;  %v180_v46 = vld [vmem:[%s754_s28 + $0x38] sm:$0xff]  ;;  %v221_v62 = vld [vmem:[%s883_s2] sm:$0x3] }
  0x1b   : > { %589 = vmatpush.msra.mxu2 %v205_v14  ;;  %605 = vmatpush.msra.mxu3 %v206_v15  ;;  %v188_v47 = vld [vmem:[%s754_s28 + $0x78] sm:$0xff]  ;;  %v785_v63 = vperm.slane %v221_v62, 0  ;;  %v787_v0 = vperm.slane %v221_v62, 1 }
  0x1c   : > { %235 = vmatpush.msra.mxu0 %v203_v16  ;;  %300 = vmatpush.msra.mxu1 %v204_v17 }
  0x1d   : > { %590 = vmatpush.msra.mxu2 %v203_v16  ;;  %606 = vmatpush.msra.mxu3 %v204_v17 }
  0x1e   : > { %236 = vmatpush.msra.mxu0 %v201_v18  ;;  %301 = vmatpush.msra.mxu1 %v202_v19 }
  0x1f   : > { %591 = vmatpush.msra.mxu2 %v201_v18  ;;  %607 = vmatpush.msra.mxu3 %v202_v19 }
  0x20   : > { %237 = vmatpush.msra.mxu0 %v199_v20  ;;  %302 = vmatpush.msra.mxu1 %v200_v21 }
  0x21   : > { %592 = vmatpush.msra.mxu2 %v199_v20  ;;  %608 = vmatpush.msra.mxu3 %v200_v21 }
  0x22   : > { %238 = vmatpush.msra.mxu0 %v197_v22  ;;  %303 = vmatpush.msra.mxu1 %v198_v23 }
  0x23   : > { %593 = vmatpush.msra.mxu2 %v197_v22  ;;  %609 = vmatpush.msra.mxu3 %v198_v23 }
  0x24   : > { %239 = vmatpush.msra.mxu0 %v195_v24  ;;  %304 = vmatpush.msra.mxu1 %v196_v25 }
  0x25   : > { %594 = vmatpush.msra.mxu2 %v195_v24  ;;  %610 = vmatpush.msra.mxu3 %v196_v25 }
  0x26   : > { %240 = vmatpush.msra.mxu0 %v193_v26  ;;  %305 = vmatpush.msra.mxu1 %v194_v27 }
  0x27   : > { %595 = vmatpush.msra.mxu2 %v193_v26  ;;  %611 = vmatpush.msra.mxu3 %v194_v27 }
  0x28   : > { %241 = vmatpush.msra.mxu0 %v191_v28  ;;  %306 = vmatpush.msra.mxu1 %v192_v29 }
  0x29   : > { %596 = vmatpush.msra.mxu2 %v191_v28  ;;  %612 = vmatpush.msra.mxu3 %v192_v29 }
  0x2a   : > { %242 = vmatpush.msra.mxu0 %v189_v30  ;;  %307 = vmatpush.msra.mxu1 %v190_v31 }
  0x2b   : > { %243 = vmatmul.f32.vlgmr.msra.gmra.mxu0 %v173_v32  ;;  %308 = vmatmul.f32.vlgmr.msra.gmra.mxu1 %v173_v32 }
  0x2c   : > { %597 = vmatpush.msra.mxu2 %v189_v30  ;;  %613 = vmatpush.msra.mxu3 %v190_v31 }
  0x2d   : > { %267 = vmatmul.f32.vlgmr.msra.gmra.mxu2 %v181_v33  ;;  %332 = vmatmul.f32.vlgmr.msra.gmra.mxu3 %v181_v33 }
  0x33   : > { %246 = vmatmul.f32.gmra.mxu0 %v174_v34  ;;  %311 = vmatmul.f32.gmra.mxu1 %v174_v34 }
  0x35   : > { %270 = vmatmul.f32.gmra.mxu2 %v182_v35  ;;  %335 = vmatmul.f32.gmra.mxu3 %v182_v35 }
  0x3b   : > { %249 = vmatmul.f32.gmra.mxu0 %v175_v36  ;;  %314 = vmatmul.f32.gmra.mxu1 %v175_v36 }
  0x3d   : > { %273 = vmatmul.f32.gmra.mxu2 %v183_v37  ;;  %338 = vmatmul.f32.gmra.mxu3 %v183_v37 }
  0x43   : > { %252 = vmatmul.f32.gmra.mxu0 %v176_v38  ;;  %317 = vmatmul.f32.gmra.mxu1 %v176_v38 }
  0x45   : > { %276 = vmatmul.f32.gmra.mxu2 %v184_v39  ;;  %341 = vmatmul.f32.gmra.mxu3 %v184_v39 }
  0x4b   : > { %255 = vmatmul.f32.gmra.mxu0 %v177_v40  ;;  %320 = vmatmul.f32.gmra.mxu1 %v177_v40 }
  0x4d   : > { %279 = vmatmul.f32.gmra.mxu2 %v185_v41  ;;  %344 = vmatmul.f32.gmra.mxu3 %v185_v41 }
  0x53   : > { %258 = vmatmul.f32.gmra.mxu0 %v178_v42  ;;  %323 = vmatmul.f32.gmra.mxu1 %v178_v42 }
  0x55   : > { %282 = vmatmul.f32.gmra.mxu2 %v186_v43  ;;  %347 = vmatmul.f32.gmra.mxu3 %v186_v43 }
  0x5b   : > { %261 = vmatmul.f32.gmra.mxu0 %v179_v44  ;;  %326 = vmatmul.f32.gmra.mxu1 %v179_v44 }
  0x5d   : > { %285 = vmatmul.f32.gmra.mxu2 %v187_v45  ;;  %350 = vmatmul.f32.gmra.mxu3 %v187_v45 }
  0x63   : > { %264 = vmatmul.f32.gmra.mxu0 %v180_v46  ;;  %329 = vmatmul.f32.gmra.mxu1 %v180_v46 }
  0x65   : > { %288 = vmatmul.f32.gmra.mxu2 %v188_v47  ;;  %353 = vmatmul.f32.gmra.mxu3 %v188_v47 }
  0xa8   : > { %v244_v48 = vpop.f32.mrf.mxu0  ;;  %v309_v49 = vpop.f32.mrf.mxu1 }
  0xa9   : > { %v245_v5 = vadd.f32 %v244_v48, %v785_v63  ;;  %v310_v6 = vadd.f32 %v309_v49, %v787_v0 }
  0xab   : > { %v357_v11 = vmax.f32 %v245_v5, 0.0  ;;  %v358_v12 = vmax.f32 %v310_v6, 0.0 }
  0xad   : > { %v431_v25 = vmul.f32 %v357_v11, %v357_v11  ;;  %v432_v26 = vmul.f32 %v358_v12, %v358_v12 }
  0xb0   : > { %v247_v50 = vpop.f32.mrf.mxu0  ;;  %v312_v51 = vpop.f32.mrf.mxu1 }
  0xb1   : > { %v268_v52 = vpop.f32.mrf.mxu2  ;;  %v333_v53 = vpop.f32.mrf.mxu3  ;;  %v248_v7 = vadd.f32 %v247_v50, %v785_v63  ;;  %v313_v8 = vadd.f32 %v312_v51, %v787_v0 }
  0xb2   : > { %v269_v9 = vadd.f32 %v268_v52, %v785_v63  ;;  %v334_v10 = vadd.f32 %v333_v53, %v787_v0 }
  0xb3   : > { %v359_v13 = vmax.f32 %v248_v7, 0.0  ;;  %v360_v14 = vmax.f32 %v313_v8, 0.0 }
  0xb4   : > { %v801_v19 = vmax.f32 %v269_v9, 0.0  ;;  %v803_v20 = vmax.f32 %v334_v10, 0.0 }
  0xb5   : > { %v433_v29 = vmul.f32 %v359_v13, %v359_v13  ;;  %v434_v30 = vmul.f32 %v360_v14, %v360_v14  ;;  %v389_v33 = vadd.f32 %v359_v13, %v357_v11  ;;  %v410_v34 = vadd.f32 %v360_v14, %v358_v12 }
  0xb6   : > { %v817_v37 = vmul.f32 %v801_v19, %v801_v19  ;;  %v821_v38 = vmul.f32 %v803_v20, %v803_v20 }
  0xb7   : > { %v463_v45 = vadd.f32 %v433_v29, %v431_v25  ;;  %v484_v46 = vadd.f32 %v434_v30, %v432_v26 }
  0xb8   : > { %v250_v54 = vpop.f32.mrf.mxu0  ;;  %v315_v55 = vpop.f32.mrf.mxu1 }
  0xb9   : > { %v271_v56 = vpop.f32.mrf.mxu2  ;;  %v336_v57 = vpop.f32.mrf.mxu3  ;;  %v251_v15 = vadd.f32 %v250_v54, %v785_v63  ;;  %v316_v16 = vadd.f32 %v315_v55, %v787_v0 }
  0xba   : > { %v272_v27 = vadd.f32 %v271_v56, %v785_v63  ;;  %v337_v28 = vadd.f32 %v336_v57, %v787_v0 }
  0xbb   : > { %v361_v31 = vmax.f32 %v251_v15, 0.0  ;;  %v362_v32 = vmax.f32 %v316_v16, 0.0 }
  0xbc   : > { %v823_v41 = vmax.f32 %v272_v27, 0.0  ;;  %v825_v42 = vmax.f32 %v337_v28, 0.0 }
  0xbd   : > { %v435_v47 = vmul.f32 %v361_v31, %v361_v31  ;;  %v436_v48 = vmul.f32 %v362_v32, %v362_v32  ;;  %v390_v49 = vadd.f32 %v389_v33, %v361_v31  ;;  %v411_v50 = vadd.f32 %v410_v34, %v362_v32 }
  0xbf   : > { %v464_v7 = vadd.f32 %v463_v45, %v435_v47  ;;  %v485_v8 = vadd.f32 %v484_v46, %v436_v48 }
  0xc0   : > { %v253_v58 = vpop.f32.mrf.mxu0  ;;  %v318_v59 = vpop.f32.mrf.mxu1 }
  0xc1   : > { %v778_v60 = vpop.f32.mrf.mxu2  ;;  %v780_v61 = vpop.f32.mrf.mxu3  ;;  %v254_v21 = vadd.f32 %v253_v58, %v785_v63  ;;  %v319_v22 = vadd.f32 %v318_v59, %v787_v0 }
  0xc2   : > { %v275_v9 = vadd.f32 %v778_v60, %v785_v63  ;;  %v340_v10 = vadd.f32 %v780_v61, %v787_v0 }
  0xc3   : > { %v363_v39 = vmax.f32 %v254_v21, 0.0  ;;  %v364_v40 = vmax.f32 %v319_v22, 0.0 }
  0xc4   : > { %v377_v27 = vmax.f32 %v275_v9, 0.0  ;;  %v378_v61 = vmax.f32 %v340_v10, 0.0 }
  0xc5   : > { %v437_v55 = vmul.f32 %v363_v39, %v363_v39  ;;  %v438_v56 = vmul.f32 %v364_v40, %v364_v40  ;;  %v391_v15 = vadd.f32 %v390_v49, %v363_v39 }
  0xc7   : > { %v465_v16 = vadd.f32 %v464_v7, %v437_v55 }
  0xc8   : > { %v256_v1 = vpop.f32.mrf.mxu0  ;;  %v321_v2 = vpop.f32.mrf.mxu1 }
  0xc9   : > { %v789_v3 = vpop.f32.mrf.mxu2  ;;  %v791_v4 = vpop.f32.mrf.mxu3  ;;  %v257_v35 = vadd.f32 %v256_v1, %v785_v63  ;;  %v322_v36 = vadd.f32 %v321_v2, %v787_v0  ;;  %v837_v1 = vmul.f32 %v823_v41, %v823_v41  ;;  %v841_v2 = vmul.f32 %v825_v42, %v825_v42 }
  0xca   : > { %v278_v22 = vadd.f32 %v789_v3, %v785_v63  ;;  %v343_v26 = vadd.f32 %v791_v4, %v787_v0 }
  0xcb   : > { %v365_v51 = vmax.f32 %v257_v35, 0.0  ;;  %v366_v52 = vmax.f32 %v322_v36, 0.0 }
  0xcc   : > { %v379_v4 = vmax.f32 %v278_v22, 0.0  ;;  %v380_v46 = vmax.f32 %v343_v26, 0.0 }
  0xcd   : > { %v439_v11 = vmul.f32 %v365_v51, %v365_v51  ;;  %v440_v12 = vmul.f32 %v366_v52, %v366_v52  ;;  %v392_v60 = vadd.f32 %v391_v15, %v365_v51 }
  0xce   : > { %v453_v7 = vmul.f32 %v379_v4, %v379_v4 }
  0xcf   : > { %v466_v29 = vadd.f32 %v465_v16, %v439_v11 }
  0xd0   : > { %v259_v17 = vpop.f32.mrf.mxu0  ;;  %v324_v18 = vpop.f32.mrf.mxu1 }
  0xd1   : > { %v807_v23 = vpop.f32.mrf.mxu2  ;;  %v809_v24 = vpop.f32.mrf.mxu3  ;;  %v260_v43 = vadd.f32 %v259_v17, %v785_v63  ;;  %v325_v44 = vadd.f32 %v324_v18, %v787_v0  ;;  %v412_v17 = vadd.f32 %v411_v50, %v364_v40  ;;  %v486_v18 = vadd.f32 %v485_v8, %v438_v56 }
  0xd2   : > { %v454_v8 = vmul.f32 %v380_v46, %v380_v46 }
  0xd3   : > { %v367_v5 = vmax.f32 %v260_v43, 0.0  ;;  %v368_v6 = vmax.f32 %v325_v44, 0.0  ;;  %v413_v28 = vadd.f32 %v412_v17, %v366_v52  ;;  %v487_v30 = vadd.f32 %v486_v18, %v440_v12 }
  0xd4   : > { %v281_v52 = vadd.f32 %v807_v23, %v785_v63 }
  0xd5   : > { %v441_v21 = vmul.f32 %v367_v5, %v367_v5  ;;  %v442_v25 = vmul.f32 %v368_v6, %v368_v6  ;;  %v393_v35 = vadd.f32 %v392_v60, %v367_v5  ;;  %v414_v36 = vadd.f32 %v413_v28, %v368_v6 }
  0xd6   : > { %v451_v5 = vmul.f32 %v377_v27, %v377_v27  ;;  %v452_v6 = vmul.f32 %v378_v61, %v378_v61 }
  0xd7   : > { %v467_v44 = vadd.f32 %v466_v29, %v441_v21  ;;  %v488_v45 = vadd.f32 %v487_v30, %v442_v25 }
  0xd8   : > { %v262_v53 = vpop.f32.mrf.mxu0  ;;  %v327_v54 = vpop.f32.mrf.mxu1 }
  0xd9   : > { %v263_v57 = vadd.f32 %v262_v53, %v785_v63  ;;  %v328_v58 = vadd.f32 %v327_v54, %v787_v0  ;;  %v831_v59 = vpop.f32.mrf.mxu2  ;;  %v833_v62 = vpop.f32.mrf.mxu3  ;;  %v346_v54 = vadd.f32 %v809_v24, %v787_v0 }
  0xda   : > { %v349_v24 = vadd.f32 %v833_v62, %v787_v0 }
  0xdb   : > { %v369_v13 = vmax.f32 %v263_v57, 0.0  ;;  %v370_v14 = vmax.f32 %v328_v58, 0.0  ;;  %v382_v23 = vmax.f32 %v346_v54, 0.0 }
  0xdd   : > { %v443_v31 = vmul.f32 %v369_v13, %v369_v13  ;;  %v444_v32 = vmul.f32 %v370_v14, %v370_v14  ;;  %v394_v47 = vadd.f32 %v393_v35, %v369_v13  ;;  %v415_v48 = vadd.f32 %v414_v36, %v370_v14 }
  0xde   : > { %v381_v13 = vmax.f32 %v281_v52, 0.0  ;;  %v284_v14 = vadd.f32 %v831_v59, %v785_v63 }
  0xdf   : > { %v468_v51 = vadd.f32 %v467_v44, %v443_v31  ;;  %v489_v53 = vadd.f32 %v488_v45, %v444_v32 }
  0xe0   : > { %v265_v33 = vpop.f32.mrf.mxu0  ;;  %v330_v34 = vpop.f32.mrf.mxu1  ;;  %v455_v60 = vmul.f32 %v381_v13, %v381_v13  ;;  %v383_v28 = vmax.f32 %v284_v14, 0.0 }
  0xe1   : > { %v266_v39 = vadd.f32 %v265_v33, %v785_v63  ;;  %v331_v3 = vadd.f32 %v330_v34, %v787_v0  ;;  %v286_v40 = vpop.f32.mrf.mxu2  ;;  %v351_v43 = vpop.f32.mrf.mxu3 }
  0xe2   : > { %v352_v22 = vadd.f32 %v351_v43, %v787_v0 }
  0xe3   : > { %v371_v49 = vmax.f32 %v266_v39, 0.0  ;;  %v372_v50 = vmax.f32 %v331_v3, 0.0 }
  0xe4   : > { %v386_v34 = vmax.f32 %v352_v22, 0.0 }
  0xe5   : > { %v395_v55 = vadd.f32 %v394_v47, %v371_v49  ;;  %v445_v56 = vmul.f32 %v371_v49, %v371_v49  ;;  %v416_v57 = vadd.f32 %v415_v48, %v372_v50  ;;  %v446_v58 = vmul.f32 %v372_v50, %v372_v50 }
  0xe6   : > { %v460_v45 = vmul.f32 %v386_v34, %v386_v34 }
  0xe7   : > { %v396_v9 = vadd.f32 %v395_v55, %v801_v19  ;;  %v469_v10 = vadd.f32 %v468_v51, %v445_v56  ;;  %v417_v11 = vadd.f32 %v416_v57, %v803_v20  ;;  %v490_v12 = vadd.f32 %v489_v53, %v446_v58 }
  0xe8   : > { %v287_v20 = vadd.f32 %v286_v40, %v785_v63 }
  0xe9   : > { %v397_v15 = vadd.f32 %v396_v9, %v823_v41  ;;  %v470_v16 = vadd.f32 %v469_v10, %v817_v37  ;;  %v418_v17 = vadd.f32 %v417_v11, %v825_v42  ;;  %v491_v19 = vadd.f32 %v490_v12, %v821_v38  ;;  %v289_v18 = vpop.f32.mrf.mxu2  ;;  %v354_v21 = vpop.f32.mrf.mxu3 }
  0xea   : > { %v290_v25 = vadd.f32 %v289_v18, %v785_v63  ;;  %v355_v59 = vadd.f32 %v354_v21, %v787_v0  ;;  %v456_v42 = vmul.f32 %v382_v23, %v382_v23  ;;  %v384_v38 = vmax.f32 %v349_v24, 0.0 }
  0xeb   : > { %v471_v62 = vadd.f32 %v470_v16, %v837_v1  ;;  %v398_v26 = vadd.f32 %v397_v15, %v377_v27  ;;  %v492_v41 = vadd.f32 %v491_v19, %v841_v2  ;;  %v419_v37 = vadd.f32 %v418_v17, %v378_v61 }
  0xec   : > { %v385_v33 = vmax.f32 %v287_v20, 0.0  ;;  %v387_v35 = vmax.f32 %v290_v25, 0.0  ;;  %v388_v63 = vmax.f32 %v355_v59, 0.0  ;;  %v457_v27 = vmul.f32 %v383_v28, %v383_v28 }
  0xed   : > { %v399_v29 = vadd.f32 %v398_v26, %v379_v4  ;;  %v472_v30 = vadd.f32 %v471_v62, %v451_v5  ;;  %v420_v31 = vadd.f32 %v419_v37, %v380_v46  ;;  %v493_v32 = vadd.f32 %v492_v41, %v452_v6 }
  0xee   : > { %v458_v3 = vmul.f32 %v384_v38, %v384_v38  ;;  %v459_v44 = vmul.f32 %v385_v33, %v385_v33  ;;  %v461_v4 = vmul.f32 %v387_v35, %v387_v35  ;;  %v462_v47 = vmul.f32 %v388_v63, %v388_v63 }
  0xef   : > { %v400_v36 = vadd.f32 %v399_v29, %v381_v13  ;;  %v473_v0 = vadd.f32 %v472_v30, %v453_v7  ;;  %v421_v39 = vadd.f32 %v420_v31, %v382_v23  ;;  %v494_v1 = vadd.f32 %v493_v32, %v454_v8 }
  0xf1   : > { %v401_v2 = vadd.f32 %v400_v36, %v383_v28  ;;  %v474_v61 = vadd.f32 %v473_v0, %v455_v60  ;;  %v422_v40 = vadd.f32 %v421_v39, %v384_v38  ;;  %v495_v43 = vadd.f32 %v494_v1, %v456_v42 }
  0xf3   : > { %v475_v46 = vadd.f32 %v474_v61, %v457_v27  ;;  %v496_v48 = vadd.f32 %v495_v43, %v458_v3  ;;  %v402_v49 = vadd.f32 %v401_v2, %v385_v33  ;;  %v423_v50 = vadd.f32 %v422_v40, %v386_v34 }
  0xf5   : > { %v476_v51 = vadd.f32 %v475_v46, %v459_v44  ;;  %v497_v52 = vadd.f32 %v496_v48, %v460_v45  ;;  %v403_v53 = vadd.f32 %v402_v49, %v387_v35  ;;  %v424_v54 = vadd.f32 %v423_v50, %v388_v63 }
  0xf7   : > { %v404_v55 = vrot.slane %v403_v53, 4  ;;  %v477_v56 = vadd.f32 %v476_v51, %v461_v4  ;;  %v425_v57 = vrot.slane %v424_v54, 4  ;;  %v498_v58 = vadd.f32 %v497_v52, %v462_v47 }
  0xf9   : > { %v405_v5 = vadd.f32 %v404_v55, %v403_v53  ;;  %v478_v6 = vrot.slane %v477_v56, 4  ;;  %v426_v7 = vadd.f32 %v425_v57, %v424_v54  ;;  %v499_v8 = vrot.slane %v498_v58, 4 }
  0xfb   : > { %v406_v9 = vrot.slane %v405_v5, 2  ;;  %v479_v10 = vadd.f32 %v478_v6, %v477_v56  ;;  %v427_v11 = vrot.slane %v426_v7, 2  ;;  %v500_v12 = vadd.f32 %v499_v8, %v498_v58 }
  0xfd   : > { %v407_v13 = vadd.f32 %v406_v9, %v405_v5  ;;  %v480_v23 = vrot.slane %v479_v10, 2  ;;  %v428_v14 = vadd.f32 %v427_v11, %v426_v7  ;;  %v501_v24 = vrot.slane %v500_v12, 2 }
  0xff   : > { %v481_v15 = vadd.f32 %v480_v23, %v479_v10  ;;  %v429_v16 = vrot.slane %v428_v14, 1  ;;  %v502_v17 = vadd.f32 %v501_v24, %v500_v12  ;;  %v408_v19 = vrot.slane %v407_v13, 1 }
 0x101   : > { %v482_v18 = vrot.slane %v481_v15, 1  ;;  %v503_v21 = vrot.slane %v502_v17, 1  ;;  %v430_v22 = vadd.f32 %v429_v16, %v428_v14  ;;  %v409_v59 = vadd.f32 %v408_v19, %v407_v13 }
 0x103   : > { %v483_v20 = vadd.f32 %v482_v18, %v481_v15  ;;  %v504_v25 = vadd.f32 %v503_v21, %v502_v17 }
 0x105   : > { %v507_v62 = vsel %vm505_vm0, %v430_v22, %v504_v25  ;;  %v506_v41 = vsel %vm505_vm0, %v409_v59, %v483_v20 }
 0x106   : > { %v510_v26 = vrot.slane %v507_v62, 6 }
 0x108   : > { %v512_v37 = vsel %vm511_vm1, %v506_v41, %v510_v26 }
 0x109   : > { %514 = vst [vmem:[%s172_s11] sm:$0xf] %v512_v37 }
 0x10a PF: > { %s13_s12 = sadd.s32 1, %s628_s12  }
 0x10b   : > { %p10_p5 = scmp.ge.s32.totalorder %s13_s12, 4  }
 0x10d   :  { %12 = sbr.rel (!%p10_p5) target bundleno = 1 (0x1), region = 62 }

// kernel: pose_encoder.7
= control target key start
LH: loop header
LB: loop body
LE: loop exit
PB: predicated region body
PF: predicated region fallthrough
CT: control target
= control target key end

     0   :  { %10 = vsyncpa [#allocation3], 0  ;;  %s1167_s0 = inlined_call_operand.vmem [shape: f32[256,128], index: 0, kind: input, shape index: {}]   ;;  %s1168_s1 = inlined_call_operand.vmem [shape: f32[128,256], index: 1, kind: input, shape index: {}]   ;;  %s1169_s2 = inlined_call_operand.vmem [shape: f32[1,256], index: 2, kind: input, shape index: {}]   ;;  %s1170_s3 = inlined_call_operand.vmem [shape: f32[1,256], index: 3, kind: input, shape index: {}]   ;;  %s1171_s4 = inlined_call_operand.vmem [shape: f32[1,256], index: 4, kind: input, shape index: {}]   ;;  %s1172_s5 = inlined_call_operand.hbm [shape: f32[256,256], index: 5, kind: output, shape index: {}]  }
   0x1   :  { %12 = vsyncpa [#allocation3 + $0x1], 0  ;;  %s813_s18 = smov 0   ;;  %s815_s19 = smov 0  }
   0x2   :  { %s817_s20 = smov 0   ;;  %s819_s21 = smov 0  }
   0x3 LB: > { %s834_s22 = sadd.s32 4294967295, %s779_s21   ;;  %s629_s23 = sadd.s32 4294967294, %s779_s21   ;;  %s779_s21 = sphi %s819_s21, %s1178_s21   ;;  %s775_s20 = sphi %s817_s20, %s1177_s20   ;;  %s771_s19 = sphi %s815_s19, %s1176_s19   ;;  %s767_s18 = sphi %s813_s18, %s1175_s18  }
   0x4   : > { %s838_s24 = sadd.s32 1, %s779_s21   ;;  %s135_s25 = sadd.s32 1, %s775_s20 }
   0x5   : > { %s132_s26 = ssub.s32 %s779_s21, %s838_s24  ;;  %p145_p0 = scmp.ne.s32.totalorder %s775_s20, %s771_s19 }
   0x6   : > { %p133_p1 = scmp.eq.s32.totalorder %s132_s26, 0  ;;  %p146_p2 = scmp.eq.s32.totalorder %s834_s22, 1 }
   0x7   : > { %p151_p3 = scmp.ne.s32.totalorder %s771_s19, %s767_s18  ;;  %p152_p4 = scmp.eq.s32.totalorder %s629_s23, 1 }
   0x8   : > { %s849_s27 = scalar_select %p133_p1, %s775_s20, %s135_s25  }
   0x9   : > { %p851_p5 = por %p146_p2, %p145_p0  ;;  %p855_p6 = por %p152_p4, %p151_p3 }
   0xa   : > { %p632_p7 = scmp.ge.s32.totalorder %s779_s21, 1  ;;  %p191_p8 = scmp.lt.s32.totalorder %s779_s21, 3 }
   0xc   : > { %p192_p9 = pnand %p632_p7, %p191_p8 }
   0xd   : > { %s634_s30 = sshll.u32 (!%p192_p9), %s834_s22, 4  ;;  %s216_s15 = sand.u32 (!%p192_p9), 1, %s771_s19  }
   0xe   : > { %195 = sbr.rel (%p192_p9) target bundleno = 252 (0xfc), region = 40  ;;  %p220_p10 = scmp.lt.s32.totalorder (!%p192_p9), %s634_s30, 31 }
   0xf   : > { %s633_s23 = sshll.u32 (!%p192_p9), %s216_s15, 8  ;;  %s551_s9 = scalar_lea.sflag (!%p192_p9), [#allocation3], %s216_s15 }
  0x10   : > { %s1011_s25 = scalar_lea.vmem (!%p192_p9), [#allocation2], %s633_s23  ;;  %s737_s14 = scalar_lea.hbm (!%p192_p9), %s1172_s5, 512 }
  0x11   : > { %s564_s7 = sshll.u32 (!%p192_p9), %s1011_s25, 4  ;;  %s565_s7 = int_to_ptr.vmem [resolvable:$true] %s564_s7 }
  0x13   : > { %v272_v0 = vld [vmem:[%s1168_s1 + $0xf0] sm:$0xff]  ;;  %v273_v1 = vld [vmem:[%s1168_s1 + $0xf8] sm:$0xff]  ;;  %v270_v2 = vld [vmem:[%s1168_s1 + $0xe0] sm:$0xff]  ;;  %s1180_s30 = smov (!%p220_p10, %s634_s30), 31 }
  0x14   : > { %644 = vmatpush.msra.mxu2 %v272_v0  ;;  %660 = vmatpush.msra.mxu3 %v273_v1  ;;  %v271_v3 = vld [vmem:[%s1168_s1 + $0xe8] sm:$0xff]  ;;  %v268_v4 = vld [vmem:[%s1168_s1 + $0xd0] sm:$0xff]  ;;  %v269_v5 = vld [vmem:[%s1168_s1 + $0xd8] sm:$0xff]  ;;  %s635_s11 = sshll.u32 %s1180_s30, 3  ;;  %s643_s30 = sshll.u32 %s834_s22, 8 }
  0x15   : > { %280 = vmatpush.msra.mxu0 %v272_v0  ;;  %345 = vmatpush.msra.mxu1 %v273_v1  ;;  %v266_v6 = vld [vmem:[%s1168_s1 + $0xc0] sm:$0xff]  ;;  %v267_v7 = vld [vmem:[%s1168_s1 + $0xc8] sm:$0xff]  ;;  %v264_v8 = vld [vmem:[%s1168_s1 + $0xb0] sm:$0xff]  ;;  %s955_s6 = scalar_lea.vmem %s1167_s0, %s635_s11 }
  0x16   : > { %645 = vmatpush.msra.mxu2 %v270_v2  ;;  %661 = vmatpush.msra.mxu3 %v271_v3  ;;  %v265_v9 = vld [vmem:[%s1168_s1 + $0xb8] sm:$0xff]  ;;  %v262_v10 = vld [vmem:[%s1168_s1 + $0xa0] sm:$0xff]  ;;  %v263_v11 = vld [vmem:[%s1168_s1 + $0xa8] sm:$0xff] }
  0x17   : > { %281 = vmatpush.msra.mxu0 %v270_v2  ;;  %346 = vmatpush.msra.mxu1 %v271_v3  ;;  %v260_v12 = vld [vmem:[%s1168_s1 + $0x90] sm:$0xff]  ;;  %v261_v13 = vld [vmem:[%s1168_s1 + $0x98] sm:$0xff]  ;;  %v258_v14 = vld [vmem:[%s1168_s1 + $0x80] sm:$0xff] }
  0x18   : > { %646 = vmatpush.msra.mxu2 %v268_v4  ;;  %662 = vmatpush.msra.mxu3 %v269_v5  ;;  %v259_v15 = vld [vmem:[%s1168_s1 + $0x88] sm:$0xff]  ;;  %v256_v16 = vld [vmem:[%s1168_s1 + $0x70] sm:$0xff]  ;;  %v257_v17 = vld [vmem:[%s1168_s1 + $0x78] sm:$0xff] }
  0x19   : > { %282 = vmatpush.msra.mxu0 %v268_v4  ;;  %347 = vmatpush.msra.mxu1 %v269_v5  ;;  %v254_v18 = vld [vmem:[%s1168_s1 + $0x60] sm:$0xff]  ;;  %v255_v19 = vld [vmem:[%s1168_s1 + $0x68] sm:$0xff]  ;;  %v252_v20 = vld [vmem:[%s1168_s1 + $0x50] sm:$0xff] }
  0x1a   : > { %647 = vmatpush.msra.mxu2 %v266_v6  ;;  %663 = vmatpush.msra.mxu3 %v267_v7  ;;  %v253_v21 = vld [vmem:[%s1168_s1 + $0x58] sm:$0xff]  ;;  %v250_v22 = vld [vmem:[%s1168_s1 + $0x40] sm:$0xff]  ;;  %v251_v23 = vld [vmem:[%s1168_s1 + $0x48] sm:$0xff] }
  0x1b   : > { %283 = vmatpush.msra.mxu0 %v266_v6  ;;  %348 = vmatpush.msra.mxu1 %v267_v7  ;;  %v248_v24 = vld [vmem:[%s1168_s1 + $0x30] sm:$0xff]  ;;  %v249_v25 = vld [vmem:[%s1168_s1 + $0x38] sm:$0xff]  ;;  %v246_v26 = vld [vmem:[%s1168_s1 + $0x20] sm:$0xff] }
  0x1c   : > { %648 = vmatpush.msra.mxu2 %v264_v8  ;;  %664 = vmatpush.msra.mxu3 %v265_v9  ;;  %v247_v27 = vld [vmem:[%s1168_s1 + $0x28] sm:$0xff]  ;;  %v244_v28 = vld [vmem:[%s1168_s1 + $0x10] sm:$0xff]  ;;  %v245_v29 = vld [vmem:[%s1168_s1 + $0x18] sm:$0xff] }
  0x1d   : > { %284 = vmatpush.msra.mxu0 %v264_v8  ;;  %349 = vmatpush.msra.mxu1 %v265_v9  ;;  %v242_v30 = vld [vmem:[%s1168_s1] sm:$0xff]  ;;  %v243_v31 = vld [vmem:[%s1168_s1 + $0x8] sm:$0xff]  ;;  %v236_v36 = vld [vmem:[%s955_s6 + $0x50] sm:$0xff] }
  0x1e   : > { %649 = vmatpush.msra.mxu2 %v262_v10  ;;  %665 = vmatpush.msra.mxu3 %v263_v11  ;;  %v234_v32 = vld [vmem:[%s955_s6 + $0x40] sm:$0xff]  ;;  %v235_v34 = vld [vmem:[%s955_s6 + $0x48] sm:$0xff]  ;;  %v228_v37 = vld [vmem:[%s955_s6 + $0x10] sm:$0xff] }
  0x1f   : > { %285 = vmatpush.msra.mxu0 %v262_v10  ;;  %350 = vmatpush.msra.mxu1 %v263_v11  ;;  %v226_v33 = vld [vmem:[%s955_s6] sm:$0xff]  ;;  %v227_v35 = vld [vmem:[%s955_s6 + $0x8] sm:$0xff]  ;;  %v237_v38 = vld [vmem:[%s955_s6 + $0x58] sm:$0xff] }
  0x20   : > { %650 = vmatpush.msra.mxu2 %v260_v12  ;;  %666 = vmatpush.msra.mxu3 %v261_v13  ;;  %v229_v39 = vld [vmem:[%s955_s6 + $0x18] sm:$0xff]  ;;  %v238_v40 = vld [vmem:[%s955_s6 + $0x60] sm:$0xff]  ;;  %v239_v42 = vld [vmem:[%s955_s6 + $0x68] sm:$0xff] }
  0x21   : > { %286 = vmatpush.msra.mxu0 %v260_v12  ;;  %351 = vmatpush.msra.mxu1 %v261_v13  ;;  %v230_v41 = vld [vmem:[%s955_s6 + $0x20] sm:$0xff]  ;;  %v231_v43 = vld [vmem:[%s955_s6 + $0x28] sm:$0xff]  ;;  %v240_v44 = vld [vmem:[%s955_s6 + $0x70] sm:$0xff] }
  0x22   : > { %651 = vmatpush.msra.mxu2 %v258_v14  ;;  %667 = vmatpush.msra.mxu3 %v259_v15  ;;  %v232_v45 = vld [vmem:[%s955_s6 + $0x30] sm:$0xff]  ;;  %v241_v46 = vld [vmem:[%s955_s6 + $0x78] sm:$0xff]  ;;  %v274_v48 = vld [vmem:[%s1169_s2] sm:$0x3] }
  0x23   : > { %287 = vmatpush.msra.mxu0 %v258_v14  ;;  %352 = vmatpush.msra.mxu1 %v259_v15  ;;  %v233_v47 = vld [vmem:[%s955_s6 + $0x38] sm:$0xff]  ;;  %v982_v49 = vperm.slane %v274_v48, 0  ;;  %v984_v50 = vperm.slane %v274_v48, 1  ;;  %v442_v51 = vld [vmem:[%s1170_s3] sm:$0x3]  ;;  %s563_s6 = scalar_lea.hbm %s1172_s5, %s643_s30 }
  0x24   : > { %652 = vmatpush.msra.mxu2 %v256_v16  ;;  %668 = vmatpush.msra.mxu3 %v257_v17  ;;  %v480_v53 = vld [vmem:[%s1171_s4] sm:$0x3]  ;;  %v994_v56 = vperm.slane %v442_v51, 0  ;;  %v997_v58 = vperm.slane %v442_v51, 1  ;;  %s566_s8 = sshll.u32 %s563_s6, 4  ;;  %s567_s8 = int_to_ptr.hbm [resolvable:$true] %s566_s8 }
  0x25   : > { %288 = vmatpush.msra.mxu0 %v256_v16  ;;  %353 = vmatpush.msra.mxu1 %v257_v17  ;;  %v1001_v60 = vperm.slane %v480_v53, 0  ;;  %v1003_v62 = vperm.slane %v480_v53, 1  ;;  %s731_s10 = sshra.s32 %s567_s8, 4  ;;  %s732_s10 = int_to_ptr.hbm [resolvable:$true] %s731_s10 }
  0x26   : > { %653 = vmatpush.msra.mxu2 %v254_v18  ;;  %669 = vmatpush.msra.mxu3 %v255_v19  ;;  %s733_s11 = scalar_lea.hbm %s732_s10, 256  ;;  %p738_p0 = scmp.lt.s32.totalorder %s732_s10, %s1172_s5 }
  0x27   : > { %289 = vmatpush.msra.mxu0 %v254_v18  ;;  %354 = vmatpush.msra.mxu1 %v255_v19  ;;  %p734_p11 = scmp.ne.s32.totalorder %s732_s10, %s733_s11  ;;  %p739_p1 = scmp.lt.s32.totalorder %s737_s14, %s733_s11 }
  0x28   : > { %654 = vmatpush.msra.mxu2 %v252_v20  ;;  %670 = vmatpush.msra.mxu3 %v253_v21 }
  0x29   : > { %290 = vmatpush.msra.mxu0 %v252_v20  ;;  %355 = vmatpush.msra.mxu1 %v253_v21  ;;  %p735_p12 = pnand %p734_p11, %p851_p5  ;;  %p740_p2 = por %p739_p1, %p738_p0 }
  0x2a   : > { %655 = vmatpush.msra.mxu2 %v250_v22  ;;  %671 = vmatpush.msra.mxu3 %v251_v23 }
  0x2b   : > { %291 = vmatpush.msra.mxu0 %v250_v22  ;;  %356 = vmatpush.msra.mxu1 %v251_v23  ;;  %p736_p13 = pneg %p735_p12 }
  0x2c   : > { %656 = vmatpush.msra.mxu2 %v248_v24  ;;  %672 = vmatpush.msra.mxu3 %v249_v25 }
  0x2d   : > { %292 = vmatpush.msra.mxu0 %v248_v24  ;;  %357 = vmatpush.msra.mxu1 %v249_v25  ;;  %p741_p3 = pnand %p740_p2, %p736_p13 }
  0x2e   : > { %657 = vmatpush.msra.mxu2 %v246_v26  ;;  %673 = vmatpush.msra.mxu3 %v247_v27 }
  0x2f   : > { %293 = vmatpush.msra.mxu0 %v246_v26  ;;  %358 = vmatpush.msra.mxu1 %v247_v27 }
  0x30   : > { %658 = vmatpush.msra.mxu2 %v244_v28  ;;  %674 = vmatpush.msra.mxu3 %v245_v29 }
  0x31   : > { %294 = vmatpush.msra.mxu0 %v244_v28  ;;  %359 = vmatpush.msra.mxu1 %v245_v29 }
  0x32   : > { %659 = vmatpush.msra.mxu2 %v242_v30  ;;  %675 = vmatpush.msra.mxu3 %v243_v31 }
  0x33   : > { %320 = vmatmul.f32.vlgmr.msra.gmra.mxu2 %v234_v32  ;;  %385 = vmatmul.f32.vlgmr.msra.gmra.mxu3 %v234_v32 }
  0x34   : > { %295 = vmatpush.msra.mxu0 %v242_v30  ;;  %360 = vmatpush.msra.mxu1 %v243_v31 }
  0x35   : > { %296 = vmatmul.f32.vlgmr.msra.gmra.mxu0 %v226_v33  ;;  %361 = vmatmul.f32.vlgmr.msra.gmra.mxu1 %v226_v33 }
  0x3b   : > { %323 = vmatmul.f32.gmra.mxu2 %v235_v34  ;;  %388 = vmatmul.f32.gmra.mxu3 %v235_v34 }
  0x3d   : > { %299 = vmatmul.f32.gmra.mxu0 %v227_v35  ;;  %364 = vmatmul.f32.gmra.mxu1 %v227_v35 }
  0x43   : > { %326 = vmatmul.f32.gmra.mxu2 %v236_v36  ;;  %391 = vmatmul.f32.gmra.mxu3 %v236_v36 }
  0x45   : > { %302 = vmatmul.f32.gmra.mxu0 %v228_v37  ;;  %367 = vmatmul.f32.gmra.mxu1 %v228_v37 }
  0x4b   : > { %329 = vmatmul.f32.gmra.mxu2 %v237_v38  ;;  %394 = vmatmul.f32.gmra.mxu3 %v237_v38 }
  0x4d   : > { %305 = vmatmul.f32.gmra.mxu0 %v229_v39  ;;  %370 = vmatmul.f32.gmra.mxu1 %v229_v39 }
  0x53   : > { %332 = vmatmul.f32.gmra.mxu2 %v238_v40  ;;  %397 = vmatmul.f32.gmra.mxu3 %v238_v40 }
  0x55   : > { %308 = vmatmul.f32.gmra.mxu0 %v230_v41  ;;  %373 = vmatmul.f32.gmra.mxu1 %v230_v41 }
  0x5b   : > { %335 = vmatmul.f32.gmra.mxu2 %v239_v42  ;;  %400 = vmatmul.f32.gmra.mxu3 %v239_v42 }
  0x5d   : > { %311 = vmatmul.f32.gmra.mxu0 %v231_v43  ;;  %376 = vmatmul.f32.gmra.mxu1 %v231_v43 }
  0x63   : > { %338 = vmatmul.f32.gmra.mxu2 %v240_v44  ;;  %403 = vmatmul.f32.gmra.mxu3 %v240_v44 }
  0x65   : > { %314 = vmatmul.f32.gmra.mxu0 %v232_v45  ;;  %379 = vmatmul.f32.gmra.mxu1 %v232_v45 }
  0x6b   : > { %341 = vmatmul.f32.gmra.mxu2 %v241_v46  ;;  %406 = vmatmul.f32.gmra.mxu3 %v241_v46 }
  0x6d   : > { %317 = vmatmul.f32.gmra.mxu0 %v233_v47  ;;  %382 = vmatmul.f32.gmra.mxu1 %v233_v47 }
  0xb2   : > { %v297_v52 = vpop.f32.mrf.mxu0  ;;  %v362_v54 = vpop.f32.mrf.mxu1 }
  0xb3   : > { %v298_v55 = vadd.f32 %v297_v52, %v982_v49  ;;  %v363_v57 = vadd.f32 %v362_v54, %v984_v50 }
  0xb5   : > { %v410_v59 = vmax.f32 %v298_v55, 0.0  ;;  %v411_v61 = vmax.f32 %v363_v57, 0.0 }
  0xb6   : > { %v321_v63 = vpop.f32.mrf.mxu2  ;;  %v386_v0 = vpop.f32.mrf.mxu3 }
  0xb7   : > { %v448_v1 = vmul.f32 %v994_v56, %v410_v59  ;;  %v322_v2 = vadd.f32 %v321_v63, %v982_v49  ;;  %v449_v3 = vmul.f32 %v997_v58, %v411_v61  ;;  %v387_v4 = vadd.f32 %v386_v0, %v984_v50 }
  0xb9   : > { %v486_v5 = vadd.f32 %v1001_v60, %v448_v1  ;;  %v426_v6 = vmax.f32 %v322_v2, 0.0  ;;  %v487_v7 = vadd.f32 %v1003_v62, %v449_v3  ;;  %v427_v8 = vmax.f32 %v387_v4, 0.0 }
  0xba   : > { %v300_v9 = vpop.f32.mrf.mxu0  ;;  %v365_v10 = vpop.f32.mrf.mxu1 }
  0xbb   : > { %518 = vst [vmem:[%s1011_s25] sm:$0xff] %v486_v5  ;;  %v464_v11 = vmul.f32 %v994_v56, %v426_v6  ;;  %v465_v12 = vmul.f32 %v997_v58, %v427_v8  ;;  %v301_v13 = vadd.f32 %v300_v9, %v982_v49  ;;  %v366_v14 = vadd.f32 %v365_v10, %v984_v50 }
  0xbc   : > { %519 = vst [vmem:[%s1011_s25 + $0x8] sm:$0xff] %v487_v7 }
  0xbd   : > { %v502_v15 = vadd.f32 %v1001_v60, %v464_v11  ;;  %v503_v16 = vadd.f32 %v1003_v62, %v465_v12  ;;  %v412_v17 = vmax.f32 %v301_v13, 0.0  ;;  %v413_v18 = vmax.f32 %v366_v14, 0.0 }
  0xbe   : > { %v324_v19 = vpop.f32.mrf.mxu2  ;;  %v389_v20 = vpop.f32.mrf.mxu3 }
  0xbf   : > { %534 = vst [vmem:[%s1011_s25 + $0x80] sm:$0xff] %v502_v15  ;;  %v450_v21 = vmul.f32 %v994_v56, %v412_v17  ;;  %v325_v22 = vadd.f32 %v324_v19, %v982_v49  ;;  %v451_v23 = vmul.f32 %v997_v58, %v413_v18  ;;  %v390_v24 = vadd.f32 %v389_v20, %v984_v50 }
  0xc0   : > { %535 = vst [vmem:[%s1011_s25 + $0x88] sm:$0xff] %v503_v16 }
  0xc1   : > { %v488_v25 = vadd.f32 %v1001_v60, %v450_v21  ;;  %v428_v26 = vmax.f32 %v325_v22, 0.0  ;;  %v489_v27 = vadd.f32 %v1003_v62, %v451_v23  ;;  %v429_v28 = vmax.f32 %v390_v24, 0.0 }
  0xc2   : > { %v303_v29 = vpop.f32.mrf.mxu0  ;;  %v368_v30 = vpop.f32.mrf.mxu1 }
  0xc3   : > { %520 = vst [vmem:[%s1011_s25 + $0x10] sm:$0xff] %v488_v25  ;;  %v466_v31 = vmul.f32 %v994_v56, %v428_v26  ;;  %v467_v32 = vmul.f32 %v997_v58, %v429_v28  ;;  %v304_v33 = vadd.f32 %v303_v29, %v982_v49  ;;  %v369_v34 = vadd.f32 %v368_v30, %v984_v50 }
  0xc4   : > { %521 = vst [vmem:[%s1011_s25 + $0x18] sm:$0xff] %v489_v27 }
  0xc5   : > { %v504_v35 = vadd.f32 %v1001_v60, %v466_v31  ;;  %v505_v36 = vadd.f32 %v1003_v62, %v467_v32  ;;  %v414_v37 = vmax.f32 %v304_v33, 0.0  ;;  %v415_v38 = vmax.f32 %v369_v34, 0.0 }
  0xc6   : > { %v327_v39 = vpop.f32.mrf.mxu2  ;;  %v392_v40 = vpop.f32.mrf.mxu3 }
  0xc7   : > { %536 = vst [vmem:[%s1011_s25 + $0x90] sm:$0xff] %v504_v35  ;;  %v452_v41 = vmul.f32 %v994_v56, %v414_v37  ;;  %v328_v42 = vadd.f32 %v327_v39, %v982_v49  ;;  %v453_v43 = vmul.f32 %v997_v58, %v415_v38  ;;  %v393_v44 = vadd.f32 %v392_v40, %v984_v50 }
  0xc8   : > { %537 = vst [vmem:[%s1011_s25 + $0x98] sm:$0xff] %v505_v36 }
  0xc9   : > { %v490_v45 = vadd.f32 %v1001_v60, %v452_v41  ;;  %v430_v46 = vmax.f32 %v328_v42, 0.0  ;;  %v491_v47 = vadd.f32 %v1003_v62, %v453_v43  ;;  %v431_v48 = vmax.f32 %v393_v44, 0.0 }
  0xca   : > { %v306_v51 = vpop.f32.mrf.mxu0  ;;  %v371_v52 = vpop.f32.mrf.mxu1 }
  0xcb   : > { %522 = vst [vmem:[%s1011_s25 + $0x20] sm:$0xff] %v490_v45  ;;  %v468_v53 = vmul.f32 %v994_v56, %v430_v46  ;;  %v469_v54 = vmul.f32 %v997_v58, %v431_v48  ;;  %v307_v55 = vadd.f32 %v306_v51, %v982_v49  ;;  %v372_v57 = vadd.f32 %v371_v52, %v984_v50 }
  0xcc   : > { %523 = vst [vmem:[%s1011_s25 + $0x28] sm:$0xff] %v491_v47 }
  0xcd   : > { %v506_v59 = vadd.f32 %v1001_v60, %v468_v53  ;;  %v507_v61 = vadd.f32 %v1003_v62, %v469_v54  ;;  %v416_v63 = vmax.f32 %v307_v55, 0.0  ;;  %v417_v0 = vmax.f32 %v372_v57, 0.0 }
  0xce   : > { %v330_v1 = vpop.f32.mrf.mxu2  ;;  %v395_v2 = vpop.f32.mrf.mxu3 }
  0xcf   : > { %538 = vst [vmem:[%s1011_s25 + $0xa0] sm:$0xff] %v506_v59  ;;  %v454_v3 = vmul.f32 %v994_v56, %v416_v63  ;;  %v331_v4 = vadd.f32 %v330_v1, %v982_v49  ;;  %v455_v5 = vmul.f32 %v997_v58, %v417_v0  ;;  %v396_v6 = vadd.f32 %v395_v2, %v984_v50 }
  0xd0   : > { %539 = vst [vmem:[%s1011_s25 + $0xa8] sm:$0xff] %v507_v61 }
  0xd1   : > { %v492_v7 = vadd.f32 %v1001_v60, %v454_v3  ;;  %v432_v8 = vmax.f32 %v331_v4, 0.0  ;;  %v493_v9 = vadd.f32 %v1003_v62, %v455_v5  ;;  %v433_v10 = vmax.f32 %v396_v6, 0.0 }
  0xd2   : > { %v309_v11 = vpop.f32.mrf.mxu0  ;;  %v374_v12 = vpop.f32.mrf.mxu1 }
  0xd3   : > { %524 = vst [vmem:[%s1011_s25 + $0x30] sm:$0xff] %v492_v7  ;;  %v470_v13 = vmul.f32 %v994_v56, %v432_v8  ;;  %v471_v14 = vmul.f32 %v997_v58, %v433_v10  ;;  %v310_v15 = vadd.f32 %v309_v11, %v982_v49  ;;  %v375_v16 = vadd.f32 %v374_v12, %v984_v50 }
  0xd4   : > { %525 = vst [vmem:[%s1011_s25 + $0x38] sm:$0xff] %v493_v9 }
  0xd5   : > { %v508_v17 = vadd.f32 %v1001_v60, %v470_v13  ;;  %v509_v18 = vadd.f32 %v1003_v62, %v471_v14  ;;  %v418_v19 = vmax.f32 %v310_v15, 0.0  ;;  %v419_v20 = vmax.f32 %v375_v16, 0.0 }
  0xd6   : > { %v333_v21 = vpop.f32.mrf.mxu2  ;;  %v398_v22 = vpop.f32.mrf.mxu3 }
  0xd7   : > { %540 = vst [vmem:[%s1011_s25 + $0xb0] sm:$0xff] %v508_v17  ;;  %v456_v23 = vmul.f32 %v994_v56, %v418_v19  ;;  %v334_v24 = vadd.f32 %v333_v21, %v982_v49  ;;  %v457_v25 = vmul.f32 %v997_v58, %v419_v20  ;;  %v399_v26 = vadd.f32 %v398_v22, %v984_v50 }
  0xd8   : > { %541 = vst [vmem:[%s1011_s25 + $0xb8] sm:$0xff] %v509_v18 }
  0xd9   : > { %v494_v27 = vadd.f32 %v1001_v60, %v456_v23  ;;  %v434_v28 = vmax.f32 %v334_v24, 0.0  ;;  %v495_v29 = vadd.f32 %v1003_v62, %v457_v25  ;;  %v435_v30 = vmax.f32 %v399_v26, 0.0 }
  0xda   : > { %v312_v31 = vpop.f32.mrf.mxu0  ;;  %v377_v32 = vpop.f32.mrf.mxu1 }
  0xdb   : > { %526 = vst [vmem:[%s1011_s25 + $0x40] sm:$0xff] %v494_v27  ;;  %v472_v33 = vmul.f32 %v994_v56, %v434_v28  ;;  %v473_v34 = vmul.f32 %v997_v58, %v435_v30  ;;  %v313_v35 = vadd.f32 %v312_v31, %v982_v49  ;;  %v378_v36 = vadd.f32 %v377_v32, %v984_v50 }
  0xdc   : > { %527 = vst [vmem:[%s1011_s25 + $0x48] sm:$0xff] %v495_v29 }
  0xdd   : > { %v510_v37 = vadd.f32 %v1001_v60, %v472_v33  ;;  %v511_v38 = vadd.f32 %v1003_v62, %v473_v34  ;;  %v420_v39 = vmax.f32 %v313_v35, 0.0  ;;  %v421_v40 = vmax.f32 %v378_v36, 0.0 }
  0xde   : > { %v336_v41 = vpop.f32.mrf.mxu2  ;;  %v401_v42 = vpop.f32.mrf.mxu3 }
  0xdf   : > { %542 = vst [vmem:[%s1011_s25 + $0xc0] sm:$0xff] %v510_v37  ;;  %v458_v43 = vmul.f32 %v994_v56, %v420_v39  ;;  %v337_v44 = vadd.f32 %v336_v41, %v982_v49  ;;  %v459_v45 = vmul.f32 %v997_v58, %v421_v40  ;;  %v402_v46 = vadd.f32 %v401_v42, %v984_v50 }
  0xe0   : > { %543 = vst [vmem:[%s1011_s25 + $0xc8] sm:$0xff] %v511_v38 }
  0xe1   : > { %v496_v47 = vadd.f32 %v1001_v60, %v458_v43  ;;  %v436_v48 = vmax.f32 %v337_v44, 0.0  ;;  %v497_v51 = vadd.f32 %v1003_v62, %v459_v45  ;;  %v437_v52 = vmax.f32 %v402_v46, 0.0 }
  0xe2   : > { %v315_v53 = vpop.f32.mrf.mxu0  ;;  %v380_v54 = vpop.f32.mrf.mxu1 }
  0xe3   : > { %528 = vst [vmem:[%s1011_s25 + $0x50] sm:$0xff] %v496_v47  ;;  %v474_v55 = vmul.f32 %v994_v56, %v436_v48  ;;  %v475_v57 = vmul.f32 %v997_v58, %v437_v52  ;;  %v316_v59 = vadd.f32 %v315_v53, %v982_v49  ;;  %v381_v61 = vadd.f32 %v380_v54, %v984_v50 }
  0xe4   : > { %529 = vst [vmem:[%s1011_s25 + $0x58] sm:$0xff] %v497_v51 }
  0xe5   : > { %v512_v63 = vadd.f32 %v1001_v60, %v474_v55  ;;  %v513_v0 = vadd.f32 %v1003_v62, %v475_v57  ;;  %v422_v1 = vmax.f32 %v316_v59, 0.0  ;;  %v423_v2 = vmax.f32 %v381_v61, 0.0 }
  0xe6   : > { %v339_v3 = vpop.f32.mrf.mxu2  ;;  %v404_v4 = vpop.f32.mrf.mxu3 }
  0xe7   : > { %544 = vst [vmem:[%s1011_s25 + $0xd0] sm:$0xff] %v512_v63  ;;  %v460_v5 = vmul.f32 %v994_v56, %v422_v1  ;;  %v340_v6 = vadd.f32 %v339_v3, %v982_v49  ;;  %v461_v7 = vmul.f32 %v997_v58, %v423_v2  ;;  %v405_v8 = vadd.f32 %v404_v4, %v984_v50 }
  0xe8   : > { %545 = vst [vmem:[%s1011_s25 + $0xd8] sm:$0xff] %v513_v0 }
  0xe9   : > { %v498_v9 = vadd.f32 %v1001_v60, %v460_v5  ;;  %v438_v10 = vmax.f32 %v340_v6, 0.0  ;;  %v499_v11 = vadd.f32 %v1003_v62, %v461_v7  ;;  %v439_v12 = vmax.f32 %v405_v8, 0.0 }
  0xea   : > { %v318_v13 = vpop.f32.mrf.mxu0  ;;  %v383_v14 = vpop.f32.mrf.mxu1 }
  0xeb   : > { %530 = vst [vmem:[%s1011_s25 + $0x60] sm:$0xff] %v498_v9  ;;  %v476_v15 = vmul.f32 %v994_v56, %v438_v10  ;;  %v477_v16 = vmul.f32 %v997_v58, %v439_v12  ;;  %v319_v17 = vadd.f32 %v318_v13, %v982_v49  ;;  %v384_v18 = vadd.f32 %v383_v14, %v984_v50 }
  0xec   : > { %531 = vst [vmem:[%s1011_s25 + $0x68] sm:$0xff] %v499_v11 }
  0xed   : > { %v514_v19 = vadd.f32 %v1001_v60, %v476_v15  ;;  %v515_v20 = vadd.f32 %v1003_v62, %v477_v16  ;;  %v424_v21 = vmax.f32 %v319_v17, 0.0  ;;  %v425_v22 = vmax.f32 %v384_v18, 0.0 }
  0xee   : > { %v342_v23 = vpop.f32.mrf.mxu2  ;;  %v407_v24 = vpop.f32.mrf.mxu3 }
  0xef   : > { %546 = vst [vmem:[%s1011_s25 + $0xe0] sm:$0xff] %v514_v19  ;;  %v462_v25 = vmul.f32 %v994_v56, %v424_v21  ;;  %v343_v26 = vadd.f32 %v342_v23, %v982_v49  ;;  %v463_v27 = vmul.f32 %v997_v58, %v425_v22  ;;  %v408_v28 = vadd.f32 %v407_v24, %v984_v50 }
  0xf0   : > { %547 = vst [vmem:[%s1011_s25 + $0xe8] sm:$0xff] %v515_v20 }
  0xf1   : > { %v500_v29 = vadd.f32 %v1001_v60, %v462_v25  ;;  %v440_v30 = vmax.f32 %v343_v26, 0.0  ;;  %v501_v31 = vadd.f32 %v1003_v62, %v463_v27  ;;  %v441_v32 = vmax.f32 %v408_v28, 0.0 }
  0xf3   : > { %532 = vst [vmem:[%s1011_s25 + $0x70] sm:$0xff] %v500_v29  ;;  %v478_v49 = vmul.f32 %v994_v56, %v440_v30  ;;  %v479_v50 = vmul.f32 %v997_v58, %v441_v32 }
  0xf4   : > { %533 = vst [vmem:[%s1011_s25 + $0x78] sm:$0xff] %v501_v31 }
  0xf5   : > { %v516_v33 = vadd.f32 %v1001_v60, %v478_v49  ;;  %v517_v34 = vadd.f32 %v1003_v62, %v479_v50 }
  0xf7   : > { %548 = vst [vmem:[%s1011_s25 + $0xf0] sm:$0xff] %v516_v33 }
  0xf8   : > { %549 = vst [vmem:[%s1011_s25 + $0xf8] sm:$0xff] %v517_v34 }
  0xf9   : > { %744 = shalt.err (!%p741_p3)
}
  0xfa   : > { %s781_s15 = smov 256   ;;  %s782_s23 = smov 16  }
  0xfb   : > { %676 = dma.vmem_to_hbm [thread:$0]  (%p851_p5), %s565_s7, 4096, %s567_s8, %s551_s9, %s781_s15, %s781_s15, %s782_s23  }
  0xfc PF: > { %p682_p4 = scmp.ge.s32.totalorder %s779_s21, 2  ;;  %s581_s25 = sand.u32 1, %s767_s18  }
  0xfd   : > { %s582_s30 = scalar_lea.sflag [#allocation3], %s581_s25 }
  0xfe   : > { %p679_p7 = pnand %p682_p4, %p855_p6 }
 0x100   : > { %p680_p8 = pneg %p679_p7 }
 0x102   : > { %762 = dma.done.wait (%p680_p8), %s582_s30, 4096  }
 0x103   : > { %764 = vsyncadd (%p680_p8), %s582_s30, 4294963200  ;;  %p15_p9 = scmp.ge.s32.totalorder %s838_s24, 4   ;;  %s1175_s18 = smov %s771_s19 }
 0x104   : > { %s1176_s19 = smov %s775_s20  ;;  %s1177_s20 = smov %s849_s27 }
 0x105   : > { %s1178_s21 = smov %s838_s24  ;;  %17 = sbr.rel (!%p15_p9) target bundleno = 3 (0x3), region = 75 }
 0x10a   :  { %588 = vsyncpa [#allocation3], 1 }
 0x10b   :  { %590 = vsyncpa [#allocation3 + $0x1], 1 }

</bundles_post_ra>
